<compile_context>
chip_gen: v7x
topology: tpu7x:2x2x1
jax: 0.10.0
libtpu: 0.0.40
codegen_flags: <defaults>
</compile_context>

<pallas_src>
import functools

import jax
import jax.numpy as jnp
from jax.experimental import pallas as pl
from jax.experimental.pallas import tpu as pltpu


EPS = 1e-5  # PyTorch LayerNorm default

_PARAM_ORDER = (
    "ln1_g", "ln1_b",
    "wqkv", "bqkv", "wo", "bo",
    "ln2_g", "ln2_b",
    "wfc", "bfc", "wproj", "bproj",
    "lna_g", "lna_b",
    "wdown", "bdown", "wup", "bup",
)

_MATMUL_WEIGHTS = ("wqkv", "wo", "wfc", "wproj", "wdown", "wup")


def _layernorm(v, g, b):
    # v: (M, D) fp32, g/b: (1, D) fp32
    mu = jnp.mean(v, axis=-1, keepdims=True)
    var = jnp.mean((v - mu) ** 2, axis=-1, keepdims=True)
    return (v - mu) * jax.lax.rsqrt(var + EPS) * g + b


def _fused_block_kernel(x_ref,
                        ln1_g, ln1_b, wqkv, bqkv, wo, bo,
                        ln2_g, ln2_b, wfc, bfc, wproj, bproj,
                        lna_g, lna_b, wdown, bdown, wup, bup,
                        o_ref, *scratch, n_head, compute_dtype):
    """One grid step = one layer `l` applied to one batch tile `bt` of shape (TB, S, D)."""
    l = pl.program_id(1)
    # Carry: when the I/O dtype is fp32 the carried activation lives in the resident
    # output block (its block index is constant along the layer axis, so the VMEM tile
    # persists and is written back to HBM only when the batch-tile index changes --
    # the last layer's value wins).  A separate fp32 scratch is used only for non-fp32
    # outputs, to preserve carry precision.
    carry = scratch[0] if scratch else o_ref

    @pl.when(l == 0)
    def _():
        carry[...] = x_ref[...].astype(carry.dtype)

    TB, S, D = carry.shape
    hd = D // n_head
    cdt = compute_dtype                                   # MXU operand dtype (bf16)

    x = carry[...].astype(jnp.float32).reshape(TB * S, D)  # leading-dim merge (free)

    def mm(a, w_ref, b_ref):
        w = w_ref[0]                                       # (in, out), compute dtype
        return jnp.dot(a.astype(w.dtype), w,
                       preferred_element_type=jnp.float32) + b_ref[0]

    # ---- self-attention branch ---------------------------------------------
    xn = _layernorm(x, ln1_g[0], ln1_b[0])
    # Fused QKV projection over all TB*S rows (fills the MXU M dim).  The 1/sqrt(hd)
    # scale is pre-folded into the Q columns of wqkv / bqkv.
    qkv = mm(xn, wqkv, bqkv)                               # (TB*S, 3D) fp32
    ctx_rows = []
    for b in range(TB):                                    # static unroll; TB is small
        qkv_t = qkv[b * S:(b + 1) * S].T                   # (3D, S) minor-most transpose
        q3 = jnp.swapaxes(qkv_t[:D].reshape(n_head, hd, S), -1, -2).astype(cdt)
        k3 = jnp.swapaxes(qkv_t[D:2 * D].reshape(n_head, hd, S), -1, -2).astype(cdt)
        v3 = jnp.swapaxes(qkv_t[2 * D:].reshape(n_head, hd, S), -1, -2).astype(cdt)

        s = jnp.einsum("hqd,hkd->hqk", q3, k3,
                       preferred_element_type=jnp.float32)  # (H, S, S)
        s = s - jnp.max(s, axis=-1, keepdims=True)
        p = jnp.exp(s)
        p = p * pl.reciprocal(jnp.sum(p, axis=-1, keepdims=True), approx=True)

        ctx = jnp.einsum("hqk,hkd->hqd", p.astype(cdt), v3,
                         preferred_element_type=jnp.float32)  # (H, S, hd)
        # Head merge: batched minor-most swap + 2-D transpose (proven to lower cleanly).
        ctx_rows.append(jnp.swapaxes(ctx, -1, -2).reshape(D, S).T)   # (S, D)
    ctx2d = ctx_rows[0] if TB == 1 else jnp.concatenate(ctx_rows, axis=0)  # (TB*S, D)
    att_out = x + mm(ctx2d, wo, bo)

    # ---- MLP branch ---------------------------------------------------------
    xn2 = _layernorm(att_out, ln2_g[0], ln2_b[0])
    h1 = mm(xn2, wfc, bfc)
    h1 = h1 * jax.nn.sigmoid(1.702 * h1)                   # QuickGELU, fp32 elementwise
    mlp_out = mm(h1, wproj, bproj)

    # ---- Adapter ('hard' flow; AdapterHub residual_input = mlp_out) ---------
    an = _layernorm(att_out + mlp_out, lna_g[0], lna_b[0])
    dwn = jnp.maximum(mm(an, wdown, bdown), 0.0)           # bottleneck padded to 128 lanes
    up = mm(dwn, wup, bup)
    x_next = (att_out + up + mlp_out).reshape(TB, S, D)    # att_out + adapter_out

    carry[...] = x_next.astype(carry.dtype)                # carry to layer l+1
    if scratch:                                            # non-fp32 output: final cast/copy
        @pl.when(l == pl.num_programs(1) - 1)
        def _():
            o_ref[...] = x_next.astype(o_ref.dtype)


def _vmem_limit_bytes(frac=0.8, fallback=128 * 1024 * 1024):
    """Per-generation VMEM limit (~128 MiB/TC on v5e/v6e, 64 MiB/TC on v7x) with headroom."""
    try:
        cap = int(pltpu.get_tpu_info().vmem_capacity_bytes)
    except Exception:  # not queryable -> conservative default
        cap = fallback
    return max(int(cap * frac), 32 * 1024 * 1024)


def _choose_batch_tile(B, S, D, n_head, down_p, act_budget_bytes, max_tile=8):
    """Largest divisor of B that (a) still leaves >= 2 parallel batch tiles for megacore
    sharding when B >= 2, (b) keeps the per-step fp32 activation footprint within budget,
    and (c) bounds the per-element attention unroll."""
    best = 1
    for tb in range(1, min(B, max_tile) + 1):
        if B % tb:
            continue
        if B >= 2 and B // tb < 2:
            continue
        m = tb * S
        act_bytes = 4 * (4 * m * D                    # x / att_out / mlp_out / attn slabs
                         + 2 * m * 4 * D              # h1 + gelu temp
                         + 2 * tb * n_head * S * S    # scores + probabilities
                         + m * max(down_p, D))        # adapter / qkv temps
        if act_bytes > act_budget_bytes:
            continue
        best = tb
    return best


def transformer_with_adapters(x_sbd, params, n_head, batch_tile=None):
    """x_sbd: (S, B, D) -- same layout as the PyTorch module (eval mode, attn_mask=None).

    `params` is the kernel-layout dict produced by prepare_kernel_params (per-layer
    parameters stacked along a leading L axis, bf16 matmul weights, scale folded into Q,
    adapter bottleneck padded to 128)."""
    S, B, D = x_sbd.shape
    assert D % n_head == 0, "n_head must divide d_model"
    x_bsd = jnp.transpose(x_sbd, (1, 0, 2))               # (B, S, D)

    args = [params[name] for name in _PARAM_ORDER]
    L = params["wqkv"].shape[0]
    P = params["wdown"].shape[-1]
    hd = D // n_head

    vmem_limit = _vmem_limit_bytes()
    TB = batch_tile or _choose_batch_tile(B, S, D, n_head, P, vmem_limit // 3)
    assert B % TB == 0
    n_bt = B // TB

    in_specs = [pl.BlockSpec((TB, S, D), lambda bt, l: (bt, 0, 0))]
    for a in args:
        nd = a.ndim
        in_specs.append(
            pl.BlockSpec((1,) + a.shape[1:],
                         lambda bt, l, _nd=nd: (l,) + (0,) * (_nd - 1)))

    carry_in_output = x_bsd.dtype == jnp.float32
    scratch_shapes = [] if carry_in_output else [pltpu.VMEM((TB, S, D), jnp.float32)]

    # Advisory cost estimate so XLA can schedule surrounding HLO around the fused call.
    matmul_flops = 2 * B * S * L * (3 * D * D + D * D + 8 * D * D + 2 * D * P)
    attn_flops = 4 * B * L * n_head * S * S * hd
    transcendentals = B * L * (n_head * S * S + 4 * D * S)
    weight_bytes = sum(int(a.size) * a.dtype.itemsize for a in args)
    bytes_accessed = weight_bytes * n_bt + 2 * B * S * D * x_bsd.dtype.itemsize
    cost = pl.CostEstimate(flops=int(matmul_flops + attn_flops),
                           transcendentals=int(transcendentals),
                           bytes_accessed=int(bytes_accessed))

    out = pl.pallas_call(
        functools.partial(_fused_block_kernel, n_head=n_head,
                          compute_dtype=params["wqkv"].dtype),
        out_shape=jax.ShapeDtypeStruct((B, S, D), x_bsd.dtype),
        grid_spec=pltpu.PrefetchScalarGridSpec(
            num_scalar_prefetch=0,
            grid=(n_bt, L),
            in_specs=in_specs,
            out_specs=pl.BlockSpec((TB, S, D), lambda bt, l: (bt, 0, 0)),
            scratch_shapes=scratch_shapes,
        ),
        compiler_params=pltpu.CompilerParams(
            dimension_semantics=("parallel", "arbitrary"),
            vmem_limit_bytes=vmem_limit,
        ),
        cost_estimate=cost,
    )(x_bsd, *args)
    return jnp.transpose(out, (1, 0, 2))                   # back to (S, B, D)


def _init_layer(key, D, down_sample):
    ks = jax.random.split(key, 6)

    def nrm(k, shape, std=0.02):
        return jax.random.normal(k, shape, jnp.float32) * std

    return {
        "ln1_g": jnp.ones((1, D), jnp.float32),
        "ln1_b": jnp.zeros((1, D), jnp.float32),
        "wqkv": nrm(ks[0], (D, 3 * D)),
        "bqkv": jnp.zeros((1, 3 * D), jnp.float32),
        "wo": nrm(ks[1], (D, D)),
        "bo": jnp.zeros((1, D), jnp.float32),
        "ln2_g": jnp.ones((1, D), jnp.float32),
        "ln2_b": jnp.zeros((1, D), jnp.float32),
        "wfc": nrm(ks[2], (D, 4 * D)),
        "bfc": jnp.zeros((1, 4 * D), jnp.float32),
        "wproj": nrm(ks[3], (4 * D, D)),
        "bproj": jnp.zeros((1, D), jnp.float32),
        "lna_g": jnp.ones((1, D), jnp.float32),
        "lna_b": jnp.zeros((1, D), jnp.float32),
        "wdown": nrm(ks[4], (D, down_sample)),
        "bdown": jnp.zeros((1, down_sample), jnp.float32),
        "wup": nrm(ks[5], (down_sample, D)),
        "bup": jnp.zeros((1, D), jnp.float32),
    }


def init_stacked_params(key, layers, D, down_sample):
    """PyTorch-equivalent params ((in,out) weight layout), stacked along a leading L axis."""
    per_layer = [_init_layer(k, D, down_sample) for k in jax.random.split(key, layers)]
    return jax.tree_util.tree_map(lambda *xs: jnp.stack(xs, axis=0), *per_layer)


def prepare_kernel_params(raw, n_head, matmul_dtype=jnp.bfloat16):
    """Kernel-layout params: fold the 1/sqrt(head_dim) scale into the Q slice of
    wqkv/bqkv, zero-pad the adapter bottleneck to a full 128-lane tile, and cast matmul
    weights to the MXU operand dtype (biases / LN params stay fp32)."""
    p = dict(raw)
    D = p["wqkv"].shape[1]
    hd = D // n_head
    scale = 1.0 / float(hd) ** 0.5

    wqkv = p["wqkv"].astype(jnp.float32)
    bqkv = p["bqkv"].astype(jnp.float32)
    p["wqkv"] = wqkv.at[:, :, :D].multiply(scale)
    p["bqkv"] = bqkv.at[:, :, :D].multiply(scale)

    ds = p["wdown"].shape[-1]
    pad = (-ds) % 128
    if pad:
        p["wdown"] = jnp.pad(p["wdown"], ((0, 0), (0, 0), (0, pad)))
        p["bdown"] = jnp.pad(p["bdown"], ((0, 0), (0, 0), (0, pad)))
        p["wup"] = jnp.pad(p["wup"], ((0, 0), (0, pad), (0, 0)))

    for name in _MATMUL_WEIGHTS:
        p[name] = p[name].astype(matmul_dtype)
    return p


def _reference_forward(x_sbd, kp, n_head):
    """Pure-JAX fp32 reference of the same forward, consuming the kernel-layout params
    (identical bf16-rounded weights, scale folded into Q, zero-padded adapter)."""
    x = jnp.transpose(x_sbd, (1, 0, 2)).astype(jnp.float32)   # (B, S, D)
    B, S, D = x.shape
    hd = D // n_head
    L = kp["wqkv"].shape[0]

    def ln(v, g, b):
        mu = v.mean(-1, keepdims=True)
        var = ((v - mu) ** 2).mean(-1, keepdims=True)
        return (v - mu) / jnp.sqrt(var + EPS) * g + b

    for l in range(L):
        p = {k: jnp.asarray(v[l], jnp.float32) for k, v in kp.items()}
        xn = ln(x, p["ln1_g"], p["ln1_b"])
        qkv = xn @ p["wqkv"] + p["bqkv"]
        q, k, v = jnp.split(qkv, 3, axis=-1)                  # scale already folded into q
        qh = q.reshape(B, S, n_head, hd).transpose(0, 2, 1, 3)
        kh = k.reshape(B, S, n_head, hd).transpose(0, 2, 1, 3)
        vh = v.reshape(B, S, n_head, hd).transpose(0, 2, 1, 3)
        att = jax.nn.softmax(qh @ jnp.swapaxes(kh, -1, -2), axis=-1) @ vh
        att = att.transpose(0, 2, 1, 3).reshape(B, S, D)
        att_out = x + att @ p["wo"] + p["bo"]
        xn2 = ln(att_out, p["ln2_g"], p["ln2_b"])
        h1 = xn2 @ p["wfc"] + p["bfc"]
        h1 = h1 * jax.nn.sigmoid(1.702 * h1)
        mlp_out = h1 @ p["wproj"] + p["bproj"]
        an = ln(att_out + mlp_out, p["lna_g"], p["lna_b"])
        up = jnp.maximum(an @ p["wdown"] + p["bdown"], 0.0) @ p["wup"] + p["bup"]
        x = att_out + up + mlp_out
    return jnp.transpose(x, (1, 0, 2))


if __name__ == "__main__":
    # Small config consistent with the module: width=32, heads=4, layers=2,
    # down_sample=16; input (seq=8, batch=2, width=32).
    width, layers, heads, down_sample = 32, 2, 4, 16
    seq, batch = 8, 2

    key = jax.random.PRNGKey(0)
    kx, kp = jax.random.split(key)
    x = jax.random.normal(kx, (seq, batch, width), jnp.float32)

    raw = init_stacked_params(kp, layers, width, down_sample)
    params = prepare_kernel_params(raw, heads, matmul_dtype=jnp.bfloat16)

    out = transformer_with_adapters(x, params, heads)
    out = jax.block_until_ready(out)
    assert out.shape == (seq, batch, width)

    ref = _reference_forward(x, params, heads)
    err = float(jnp.max(jnp.abs(out - ref)))
    assert err < 2e-2, f"max abs error vs reference: {err}"
    print("KERNEL_OK")
</pallas_src>

<mosaic_0001>
module attributes {stable_mosaic.version = 11 : i64} {
  func.func @_fused_block_kernel(%arg0: i32, %arg1: i32, %arg2: memref<1x8x32xf32, #tpu.memory_space<vmem>>, %arg3: memref<1x1x32xf32, #tpu.memory_space<vmem>>, %arg4: memref<1x1x32xf32, #tpu.memory_space<vmem>>, %arg5: memref<1x32x96xbf16, #tpu.memory_space<vmem>>, %arg6: memref<1x1x96xf32, #tpu.memory_space<vmem>>, %arg7: memref<1x32x32xbf16, #tpu.memory_space<vmem>>, %arg8: memref<1x1x32xf32, #tpu.memory_space<vmem>>, %arg9: memref<1x1x32xf32, #tpu.memory_space<vmem>>, %arg10: memref<1x1x32xf32, #tpu.memory_space<vmem>>, %arg11: memref<1x32x128xbf16, #tpu.memory_space<vmem>>, %arg12: memref<1x1x128xf32, #tpu.memory_space<vmem>>, %arg13: memref<1x128x32xbf16, #tpu.memory_space<vmem>>, %arg14: memref<1x1x32xf32, #tpu.memory_space<vmem>>, %arg15: memref<1x1x32xf32, #tpu.memory_space<vmem>>, %arg16: memref<1x1x32xf32, #tpu.memory_space<vmem>>, %arg17: memref<1x32x128xbf16, #tpu.memory_space<vmem>>, %arg18: memref<1x1x128xf32, #tpu.memory_space<vmem>>, %arg19: memref<1x128x32xbf16, #tpu.memory_space<vmem>>, %arg20: memref<1x1x32xf32, #tpu.memory_space<vmem>>, %arg21: memref<1x8x32xf32, #tpu.memory_space<vmem>>) attributes {dimension_semantics = [#tpu.dimension_semantics<parallel>, #tpu.dimension_semantics<arbitrary>], iteration_bounds = array<i64: 2, 2>, scalar_prefetch = 0 : i64, scratch_operands = 0 : i64, tpu.core_type = #tpu.core_type<tc>, window_params = [{transform_indices = @transform_0, window_bounds = array<i64: 1, 8, 32>}, {transform_indices = @transform_1, window_bounds = array<i64: 1, 1, 32>}, {transform_indices = @transform_2, window_bounds = array<i64: 1, 1, 32>}, {transform_indices = @transform_3, window_bounds = array<i64: 1, 32, 96>}, {transform_indices = @transform_4, window_bounds = array<i64: 1, 1, 96>}, {transform_indices = @transform_5, window_bounds = array<i64: 1, 32, 32>}, {transform_indices = @transform_6, window_bounds = array<i64: 1, 1, 32>}, {transform_indices = @transform_7, window_bounds = array<i64: 1, 1, 32>}, {transform_indices = @transform_8, window_bounds = array<i64: 1, 1, 32>}, {transform_indices = @transform_9, window_bounds = array<i64: 1, 32, 128>}, {transform_indices = @transform_10, window_bounds = array<i64: 1, 1, 128>}, {transform_indices = @transform_11, window_bounds = array<i64: 1, 128, 32>}, {transform_indices = @transform_12, window_bounds = array<i64: 1, 1, 32>}, {transform_indices = @transform_13, window_bounds = array<i64: 1, 1, 32>}, {transform_indices = @transform_14, window_bounds = array<i64: 1, 1, 32>}, {transform_indices = @transform_15, window_bounds = array<i64: 1, 32, 128>}, {transform_indices = @transform_16, window_bounds = array<i64: 1, 1, 128>}, {transform_indices = @transform_17, window_bounds = array<i64: 1, 128, 32>}, {transform_indices = @transform_18, window_bounds = array<i64: 1, 1, 32>}, {transform_indices = @transform_19, window_bounds = array<i64: 1, 8, 32>}]} {
    %c0_i32 = arith.constant 0 : i32
    %0 = arith.cmpi eq, %arg1, %c0_i32 : i32
    %1 = arith.extui %0 : i1 to i32
    %c0_i32_0 = arith.constant 0 : i32
    %2 = arith.cmpi ne, %1, %c0_i32_0 : i32
    scf.if %2 {
      %c0_87 = arith.constant 0 : index
      %c0_88 = arith.constant 0 : index
      %c0_89 = arith.constant 0 : index
      %176 = vector.load %arg2[%c0_87, %c0_88, %c0_89] : memref<1x8x32xf32, #tpu.memory_space<vmem>>, vector<1x8x32xf32>
      %c0_90 = arith.constant 0 : index
      %c0_91 = arith.constant 0 : index
      %c0_92 = arith.constant 0 : index
      %177 = vector.load %arg21[%c0_90, %c0_91, %c0_92] : memref<1x8x32xf32, #tpu.memory_space<vmem>>, vector<1x8x32xf32>
      tpu.vector_store %arg21[%c0_90, %c0_91, %c0_92], %176 {strides = array<i32>} : memref<1x8x32xf32, #tpu.memory_space<vmem>>, vector<1x8x32xf32>,
    } else {
    }
    %c0 = arith.constant 0 : index
    %c0_1 = arith.constant 0 : index
    %c0_2 = arith.constant 0 : index
    %3 = vector.load %arg21[%c0, %c0_1, %c0_2] : memref<1x8x32xf32, #tpu.memory_space<vmem>>, vector<1x8x32xf32>
    %4 = vector.shape_cast %3 : vector<1x8x32xf32> to vector<8x32xf32>
    %c0_3 = arith.constant 0 : index
    %c0_4 = arith.constant 0 : index
    %c0_5 = arith.constant 0 : index
    %5 = vector.load %arg3[%c0_3, %c0_4, %c0_5] : memref<1x1x32xf32, #tpu.memory_space<vmem>>, vector<1x1x32xf32>
    %6 = vector.shape_cast %5 : vector<1x1x32xf32> to vector<1x32xf32>
    %c0_6 = arith.constant 0 : index
    %c0_7 = arith.constant 0 : index
    %c0_8 = arith.constant 0 : index
    %7 = vector.load %arg4[%c0_6, %c0_7, %c0_8] : memref<1x1x32xf32, #tpu.memory_space<vmem>>, vector<1x1x32xf32>
    %8 = vector.shape_cast %7 : vector<1x1x32xf32> to vector<1x32xf32>
    %cst = arith.constant dense<0.000000e+00> : vector<8xf32>
    %9 = vector.multi_reduction <add>, %4, %cst [1] : vector<8x32xf32> to vector<8xf32>
    %10 = vector.shape_cast %9 : vector<8xf32> to vector<8x1xf32>
    %cst_9 = arith.constant 3.200000e+01 : f32
    %11 = vector.broadcast %cst_9 : f32 to vector<8x1xf32>
    %12 = arith.divf %10, %11 : vector<8x1xf32>
    %13 = vector.broadcast %12 : vector<8x1xf32> to vector<8x32xf32>
    %14 = arith.subf %4, %13 : vector<8x32xf32>
    %15 = arith.mulf %14, %14 : vector<8x32xf32>
    %cst_10 = arith.constant dense<0.000000e+00> : vector<8xf32>
    %16 = vector.multi_reduction <add>, %15, %cst_10 [1] : vector<8x32xf32> to vector<8xf32>
    %17 = vector.shape_cast %16 : vector<8xf32> to vector<8x1xf32>
    %cst_11 = arith.constant 3.200000e+01 : f32
    %18 = vector.broadcast %cst_11 : f32 to vector<8x1xf32>
    %19 = arith.divf %17, %18 : vector<8x1xf32>
    %20 = vector.broadcast %12 : vector<8x1xf32> to vector<8x32xf32>
    %21 = arith.subf %4, %20 : vector<8x32xf32>
    %cst_12 = arith.constant 9.99999974E-6 : f32
    %22 = vector.broadcast %cst_12 : f32 to vector<8x1xf32>
    %23 = arith.addf %19, %22 : vector<8x1xf32>
    %24 = math.rsqrt %23 : vector<8x1xf32>
    %25 = vector.broadcast %24 : vector<8x1xf32> to vector<8x32xf32>
    %26 = arith.mulf %21, %25 : vector<8x32xf32>
    %27 = vector.broadcast %6 : vector<1x32xf32> to vector<8x32xf32>
    %28 = arith.mulf %26, %27 : vector<8x32xf32>
    %29 = vector.broadcast %8 : vector<1x32xf32> to vector<8x32xf32>
    %30 = arith.addf %28, %29 : vector<8x32xf32>
    %c0_13 = arith.constant 0 : index
    %c0_14 = arith.constant 0 : index
    %c0_15 = arith.constant 0 : index
    %31 = vector.load %arg5[%c0_13, %c0_14, %c0_15] : memref<1x32x96xbf16, #tpu.memory_space<vmem>>, vector<1x32x96xbf16>
    %32 = vector.shape_cast %31 : vector<1x32x96xbf16> to vector<32x96xbf16>
    %33 = arith.truncf %30 : vector<8x32xf32> to vector<8x32xbf16>
    %cst_16 = arith.constant dense<0.000000e+00> : vector<8x96xf32>
    %34 = tpu.matmul %33, %32, %cst_16 {dimension_numbers = #tpu.dot_dimension_numbers<[1], [0], [0], [1], [0, 0, 1, 1], [], []>} : vector<8x32xbf16>, vector<32x96xbf16>, vector<8x96xf32> -> vector<8x96xf32>
    %c0_17 = arith.constant 0 : index
    %c0_18 = arith.constant 0 : index
    %c0_19 = arith.constant 0 : index
    %35 = vector.load %arg6[%c0_17, %c0_18, %c0_19] : memref<1x1x96xf32, #tpu.memory_space<vmem>>, vector<1x1x96xf32>
    %36 = vector.shape_cast %35 : vector<1x1x96xf32> to vector<1x96xf32>
    %37 = vector.broadcast %36 : vector<1x96xf32> to vector<8x96xf32>
    %38 = arith.addf %34, %37 : vector<8x96xf32>
    %39 = tpu.transpose %38, [1, 0] : vector<8x96xf32> -> vector<96x8xf32>
    %40 = vector.extract_strided_slice %39 {offsets = [0, 0], sizes = [32, 8], strides = [1, 1]} : vector<96x8xf32> to vector<32x8xf32>
    %41 = vector.shape_cast %40 : vector<32x8xf32> to vector<4x8x8xf32>
    %42 = tpu.transpose %41, [0, 2, 1] : vector<4x8x8xf32> -> vector<4x8x8xf32>
    %43 = arith.truncf %42 : vector<4x8x8xf32> to vector<4x8x8xbf16>
    %44 = vector.extract_strided_slice %39 {offsets = [32, 0], sizes = [32, 8], strides = [1, 1]} : vector<96x8xf32> to vector<32x8xf32>
    %45 = vector.shape_cast %44 : vector<32x8xf32> to vector<4x8x8xf32>
    %46 = tpu.transpose %45, [0, 2, 1] : vector<4x8x8xf32> -> vector<4x8x8xf32>
    %47 = arith.truncf %46 : vector<4x8x8xf32> to vector<4x8x8xbf16>
    %48 = vector.extract_strided_slice %39 {offsets = [64, 0], sizes = [32, 8], strides = [1, 1]} : vector<96x8xf32> to vector<32x8xf32>
    %49 = vector.shape_cast %48 : vector<32x8xf32> to vector<4x8x8xf32>
    %50 = tpu.transpose %49, [0, 2, 1] : vector<4x8x8xf32> -> vector<4x8x8xf32>
    %51 = arith.truncf %50 : vector<4x8x8xf32> to vector<4x8x8xbf16>
    "tpu.trace_start"() <{level = 10 : i32, message = "hqd,hkd->hqk"}> : () -> ()
    %cst_20 = arith.constant dense<0.000000e+00> : vector<4x8x8xf32>
    %52 = tpu.matmul %43, %47, %cst_20 {dimension_numbers = #tpu.dot_dimension_numbers<[2], [2], [1], [1], [0, 0, 0, 1, 1, 1], [0], [0]>} : vector<4x8x8xbf16>, vector<4x8x8xbf16>, vector<4x8x8xf32> -> vector<4x8x8xf32>
    "tpu.trace_stop"() : () -> ()
    %cst_21 = arith.constant dense<0xFF800000> : vector<4x8xf32>
    %53 = vector.multi_reduction <maximumf>, %52, %cst_21 [2] : vector<4x8x8xf32> to vector<4x8xf32>
    %54 = vector.shape_cast %53 : vector<4x8xf32> to vector<4x8x1xf32>
    %55 = vector.broadcast %54 : vector<4x8x1xf32> to vector<4x8x8xf32>
    %56 = arith.subf %52, %55 : vector<4x8x8xf32>
    %57 = math.exp %56 : vector<4x8x8xf32>
    %cst_22 = arith.constant dense<0.000000e+00> : vector<4x8xf32>
    %58 = vector.multi_reduction <add>, %57, %cst_22 [2] : vector<4x8x8xf32> to vector<4x8xf32>
    %59 = vector.shape_cast %58 : vector<4x8xf32> to vector<4x8x1xf32>
    %60 = tpu.reciprocal %59 {approx = true} : vector<4x8x1xf32> -> vector<4x8x1xf32>
    %61 = vector.broadcast %60 : vector<4x8x1xf32> to vector<4x8x8xf32>
    %62 = arith.mulf %57, %61 : vector<4x8x8xf32>
    %63 = arith.truncf %62 : vector<4x8x8xf32> to vector<4x8x8xbf16>
    "tpu.trace_start"() <{level = 10 : i32, message = "hqk,hkd->hqd"}> : () -> ()
    %cst_23 = arith.constant dense<0.000000e+00> : vector<4x8x8xf32>
    %64 = tpu.matmul %63, %51, %cst_23 {dimension_numbers = #tpu.dot_dimension_numbers<[2], [1], [1], [2], [0, 0, 0, 1, 1, 2], [0], [0]>} : vector<4x8x8xbf16>, vector<4x8x8xbf16>, vector<4x8x8xf32> -> vector<4x8x8xf32>
    "tpu.trace_stop"() : () -> ()
    %65 = tpu.transpose %64, [0, 2, 1] : vector<4x8x8xf32> -> vector<4x8x8xf32>
    %66 = vector.shape_cast %65 : vector<4x8x8xf32> to vector<32x8xf32>
    %67 = tpu.transpose %66, [1, 0] : vector<32x8xf32> -> vector<8x32xf32>
    %c0_24 = arith.constant 0 : index
    %c0_25 = arith.constant 0 : index
    %c0_26 = arith.constant 0 : index
    %68 = vector.load %arg7[%c0_24, %c0_25, %c0_26] : memref<1x32x32xbf16, #tpu.memory_space<vmem>>, vector<1x32x32xbf16>
    %69 = vector.shape_cast %68 : vector<1x32x32xbf16> to vector<32x32xbf16>
    %70 = arith.truncf %67 : vector<8x32xf32> to vector<8x32xbf16>
    %cst_27 = arith.constant dense<0.000000e+00> : vector<8x32xf32>
    %71 = tpu.matmul %70, %69, %cst_27 {dimension_numbers = #tpu.dot_dimension_numbers<[1], [0], [0], [1], [0, 0, 1, 1], [], []>} : vector<8x32xbf16>, vector<32x32xbf16>, vector<8x32xf32> -> vector<8x32xf32>
    %c0_28 = arith.constant 0 : index
    %c0_29 = arith.constant 0 : index
    %c0_30 = arith.constant 0 : index
    %72 = vector.load %arg8[%c0_28, %c0_29, %c0_30] : memref<1x1x32xf32, #tpu.memory_space<vmem>>, vector<1x1x32xf32>
    %73 = vector.shape_cast %72 : vector<1x1x32xf32> to vector<1x32xf32>
    %74 = vector.broadcast %73 : vector<1x32xf32> to vector<8x32xf32>
    %75 = arith.addf %71, %74 : vector<8x32xf32>
    %76 = arith.addf %4, %75 : vector<8x32xf32>
    %c0_31 = arith.constant 0 : index
    %c0_32 = arith.constant 0 : index
    %c0_33 = arith.constant 0 : index
    %77 = vector.load %arg9[%c0_31, %c0_32, %c0_33] : memref<1x1x32xf32, #tpu.memory_space<vmem>>, vector<1x1x32xf32>
    %78 = vector.shape_cast %77 : vector<1x1x32xf32> to vector<1x32xf32>
    %c0_34 = arith.constant 0 : index
    %c0_35 = arith.constant 0 : index
    %c0_36 = arith.constant 0 : index
    %79 = vector.load %arg10[%c0_34, %c0_35, %c0_36] : memref<1x1x32xf32, #tpu.memory_space<vmem>>, vector<1x1x32xf32>
    %80 = vector.shape_cast %79 : vector<1x1x32xf32> to vector<1x32xf32>
    %cst_37 = arith.constant dense<0.000000e+00> : vector<8xf32>
    %81 = vector.multi_reduction <add>, %76, %cst_37 [1] : vector<8x32xf32> to vector<8xf32>
    %82 = vector.shape_cast %81 : vector<8xf32> to vector<8x1xf32>
    %cst_38 = arith.constant 3.200000e+01 : f32
    %83 = vector.broadcast %cst_38 : f32 to vector<8x1xf32>
    %84 = arith.divf %82, %83 : vector<8x1xf32>
    %85 = vector.broadcast %84 : vector<8x1xf32> to vector<8x32xf32>
    %86 = arith.subf %76, %85 : vector<8x32xf32>
    %87 = arith.mulf %86, %86 : vector<8x32xf32>
    %cst_39 = arith.constant dense<0.000000e+00> : vector<8xf32>
    %88 = vector.multi_reduction <add>, %87, %cst_39 [1] : vector<8x32xf32> to vector<8xf32>
    %89 = vector.shape_cast %88 : vector<8xf32> to vector<8x1xf32>
    %cst_40 = arith.constant 3.200000e+01 : f32
    %90 = vector.broadcast %cst_40 : f32 to vector<8x1xf32>
    %91 = arith.divf %89, %90 : vector<8x1xf32>
    %92 = vector.broadcast %84 : vector<8x1xf32> to vector<8x32xf32>
    %93 = arith.subf %76, %92 : vector<8x32xf32>
    %cst_41 = arith.constant 9.99999974E-6 : f32
    %94 = vector.broadcast %cst_41 : f32 to vector<8x1xf32>
    %95 = arith.addf %91, %94 : vector<8x1xf32>
    %96 = math.rsqrt %95 : vector<8x1xf32>
    %97 = vector.broadcast %96 : vector<8x1xf32> to vector<8x32xf32>
    %98 = arith.mulf %93, %97 : vector<8x32xf32>
    %99 = vector.broadcast %78 : vector<1x32xf32> to vector<8x32xf32>
    %100 = arith.mulf %98, %99 : vector<8x32xf32>
    %101 = vector.broadcast %80 : vector<1x32xf32> to vector<8x32xf32>
    %102 = arith.addf %100, %101 : vector<8x32xf32>
    %c0_42 = arith.constant 0 : index
    %c0_43 = arith.constant 0 : index
    %c0_44 = arith.constant 0 : index
    %103 = vector.load %arg11[%c0_42, %c0_43, %c0_44] : memref<1x32x128xbf16, #tpu.memory_space<vmem>>, vector<1x32x128xbf16>
    %104 = vector.shape_cast %103 : vector<1x32x128xbf16> to vector<32x128xbf16>
    %105 = arith.truncf %102 : vector<8x32xf32> to vector<8x32xbf16>
    %cst_45 = arith.constant dense<0.000000e+00> : vector<8x128xf32>
    %106 = tpu.matmul %105, %104, %cst_45 {dimension_numbers = #tpu.dot_dimension_numbers<[1], [0], [0], [1], [0, 0, 1, 1], [], []>} : vector<8x32xbf16>, vector<32x128xbf16>, vector<8x128xf32> -> vector<8x128xf32>
    %c0_46 = arith.constant 0 : index
    %c0_47 = arith.constant 0 : index
    %c0_48 = arith.constant 0 : index
    %107 = vector.load %arg12[%c0_46, %c0_47, %c0_48] : memref<1x1x128xf32, #tpu.memory_space<vmem>>, vector<1x1x128xf32>
    %108 = vector.shape_cast %107 : vector<1x1x128xf32> to vector<1x128xf32>
    %109 = vector.broadcast %108 : vector<1x128xf32> to vector<8x128xf32>
    %110 = arith.addf %106, %109 : vector<8x128xf32>
    %cst_49 = arith.constant 1.702000e+00 : f32
    %111 = vector.broadcast %cst_49 : f32 to vector<8x128xf32>
    %112 = arith.mulf %111, %110 : vector<8x128xf32>
    %113 = arith.negf %112 : vector<8x128xf32>
    %114 = math.exp %113 : vector<8x128xf32>
    %cst_50 = arith.constant 1.000000e+00 : f32
    %115 = vector.broadcast %cst_50 : f32 to vector<8x128xf32>
    %116 = arith.addf %115, %114 : vector<8x128xf32>
    %117 = arith.divf %115, %116 : vector<8x128xf32>
    %118 = arith.mulf %110, %117 : vector<8x128xf32>
    %c0_51 = arith.constant 0 : index
    %c0_52 = arith.constant 0 : index
    %c0_53 = arith.constant 0 : index
    %119 = vector.load %arg13[%c0_51, %c0_52, %c0_53] : memref<1x128x32xbf16, #tpu.memory_space<vmem>>, vector<1x128x32xbf16>
    %120 = vector.shape_cast %119 : vector<1x128x32xbf16> to vector<128x32xbf16>
    %121 = arith.truncf %118 : vector<8x128xf32> to vector<8x128xbf16>
    %cst_54 = arith.constant dense<0.000000e+00> : vector<8x32xf32>
    %122 = tpu.matmul %121, %120, %cst_54 {dimension_numbers = #tpu.dot_dimension_numbers<[1], [0], [0], [1], [0, 0, 1, 1], [], []>} : vector<8x128xbf16>, vector<128x32xbf16>, vector<8x32xf32> -> vector<8x32xf32>
    %c0_55 = arith.constant 0 : index
    %c0_56 = arith.constant 0 : index
    %c0_57 = arith.constant 0 : index
    %123 = vector.load %arg14[%c0_55, %c0_56, %c0_57] : memref<1x1x32xf32, #tpu.memory_space<vmem>>, vector<1x1x32xf32>
    %124 = vector.shape_cast %123 : vector<1x1x32xf32> to vector<1x32xf32>
    %125 = vector.broadcast %124 : vector<1x32xf32> to vector<8x32xf32>
    %126 = arith.addf %122, %125 : vector<8x32xf32>
    %127 = arith.addf %76, %126 : vector<8x32xf32>
    %c0_58 = arith.constant 0 : index
    %c0_59 = arith.constant 0 : index
    %c0_60 = arith.constant 0 : index
    %128 = vector.load %arg15[%c0_58, %c0_59, %c0_60] : memref<1x1x32xf32, #tpu.memory_space<vmem>>, vector<1x1x32xf32>
    %129 = vector.shape_cast %128 : vector<1x1x32xf32> to vector<1x32xf32>
    %c0_61 = arith.constant 0 : index
    %c0_62 = arith.constant 0 : index
    %c0_63 = arith.constant 0 : index
    %130 = vector.load %arg16[%c0_61, %c0_62, %c0_63] : memref<1x1x32xf32, #tpu.memory_space<vmem>>, vector<1x1x32xf32>
    %131 = vector.shape_cast %130 : vector<1x1x32xf32> to vector<1x32xf32>
    %cst_64 = arith.constant dense<0.000000e+00> : vector<8xf32>
    %132 = vector.multi_reduction <add>, %127, %cst_64 [1] : vector<8x32xf32> to vector<8xf32>
    %133 = vector.shape_cast %132 : vector<8xf32> to vector<8x1xf32>
    %cst_65 = arith.constant 3.200000e+01 : f32
    %134 = vector.broadcast %cst_65 : f32 to vector<8x1xf32>
    %135 = arith.divf %133, %134 : vector<8x1xf32>
    %136 = vector.broadcast %135 : vector<8x1xf32> to vector<8x32xf32>
    %137 = arith.subf %127, %136 : vector<8x32xf32>
    %138 = arith.mulf %137, %137 : vector<8x32xf32>
    %cst_66 = arith.constant dense<0.000000e+00> : vector<8xf32>
    %139 = vector.multi_reduction <add>, %138, %cst_66 [1] : vector<8x32xf32> to vector<8xf32>
    %140 = vector.shape_cast %139 : vector<8xf32> to vector<8x1xf32>
    %cst_67 = arith.constant 3.200000e+01 : f32
    %141 = vector.broadcast %cst_67 : f32 to vector<8x1xf32>
    %142 = arith.divf %140, %141 : vector<8x1xf32>
    %143 = vector.broadcast %135 : vector<8x1xf32> to vector<8x32xf32>
    %144 = arith.subf %127, %143 : vector<8x32xf32>
    %cst_68 = arith.constant 9.99999974E-6 : f32
    %145 = vector.broadcast %cst_68 : f32 to vector<8x1xf32>
    %146 = arith.addf %142, %145 : vector<8x1xf32>
    %147 = math.rsqrt %146 : vector<8x1xf32>
    %148 = vector.broadcast %147 : vector<8x1xf32> to vector<8x32xf32>
    %149 = arith.mulf %144, %148 : vector<8x32xf32>
    %150 = vector.broadcast %129 : vector<1x32xf32> to vector<8x32xf32>
    %151 = arith.mulf %149, %150 : vector<8x32xf32>
    %152 = vector.broadcast %131 : vector<1x32xf32> to vector<8x32xf32>
    %153 = arith.addf %151, %152 : vector<8x32xf32>
    %c0_69 = arith.constant 0 : index
    %c0_70 = arith.constant 0 : index
    %c0_71 = arith.constant 0 : index
    %154 = vector.load %arg17[%c0_69, %c0_70, %c0_71] : memref<1x32x128xbf16, #tpu.memory_space<vmem>>, vector<1x32x128xbf16>
    %155 = vector.shape_cast %154 : vector<1x32x128xbf16> to vector<32x128xbf16>
    %156 = arith.truncf %153 : vector<8x32xf32> to vector<8x32xbf16>
    %cst_72 = arith.constant dense<0.000000e+00> : vector<8x128xf32>
    %157 = tpu.matmul %156, %155, %cst_72 {dimension_numbers = #tpu.dot_dimension_numbers<[1], [0], [0], [1], [0, 0, 1, 1], [], []>} : vector<8x32xbf16>, vector<32x128xbf16>, vector<8x128xf32> -> vector<8x128xf32>
    %c0_73 = arith.constant 0 : index
    %c0_74 = arith.constant 0 : index
    %c0_75 = arith.constant 0 : index
    %158 = vector.load %arg18[%c0_73, %c0_74, %c0_75] : memref<1x1x128xf32, #tpu.memory_space<vmem>>, vector<1x1x128xf32>
    %159 = vector.shape_cast %158 : vector<1x1x128xf32> to vector<1x128xf32>
    %160 = vector.broadcast %159 : vector<1x128xf32> to vector<8x128xf32>
    %161 = arith.addf %157, %160 : vector<8x128xf32>
    %cst_76 = arith.constant 0.000000e+00 : f32
    %162 = vector.broadcast %cst_76 : f32 to vector<8x128xf32>
    %163 = arith.maximumf %161, %162 : vector<8x128xf32>
    %c0_77 = arith.constant 0 : index
    %c0_78 = arith.constant 0 : index
    %c0_79 = arith.constant 0 : index
    %164 = vector.load %arg19[%c0_77, %c0_78, %c0_79] : memref<1x128x32xbf16, #tpu.memory_space<vmem>>, vector<1x128x32xbf16>
    %165 = vector.shape_cast %164 : vector<1x128x32xbf16> to vector<128x32xbf16>
    %166 = arith.truncf %163 : vector<8x128xf32> to vector<8x128xbf16>
    %cst_80 = arith.constant dense<0.000000e+00> : vector<8x32xf32>
    %167 = tpu.matmul %166, %165, %cst_80 {dimension_numbers = #tpu.dot_dimension_numbers<[1], [0], [0], [1], [0, 0, 1, 1], [], []>} : vector<8x128xbf16>, vector<128x32xbf16>, vector<8x32xf32> -> vector<8x32xf32>
    %c0_81 = arith.constant 0 : index
    %c0_82 = arith.constant 0 : index
    %c0_83 = arith.constant 0 : index
    %168 = vector.load %arg20[%c0_81, %c0_82, %c0_83] : memref<1x1x32xf32, #tpu.memory_space<vmem>>, vector<1x1x32xf32>
    %169 = vector.shape_cast %168 : vector<1x1x32xf32> to vector<1x32xf32>
    %170 = vector.broadcast %169 : vector<1x32xf32> to vector<8x32xf32>
    %171 = arith.addf %167, %170 : vector<8x32xf32>
    %172 = arith.addf %76, %171 : vector<8x32xf32>
    %173 = arith.addf %172, %126 : vector<8x32xf32>
    %174 = vector.shape_cast %173 : vector<8x32xf32> to vector<1x8x32xf32>
    %c0_84 = arith.constant 0 : index
    %c0_85 = arith.constant 0 : index
    %c0_86 = arith.constant 0 : index
    %175 = vector.load %arg21[%c0_84, %c0_85, %c0_86] : memref<1x8x32xf32, #tpu.memory_space<vmem>>, vector<1x8x32xf32>
    tpu.vector_store %arg21[%c0_84, %c0_85, %c0_86], %174 {strides = array<i32>} : memref<1x8x32xf32, #tpu.memory_space<vmem>>, vector<1x8x32xf32>,
    return
  }
  func.func @transform_0(%arg0: i32, %arg1: i32) -> (i32, i32, i32) {
    %c0_i32 = arith.constant 0 : i32
    %c0_i32_0 = arith.constant 0 : i32
    %c0_i32_1 = arith.constant 0 : i32
    return %arg0, %c0_i32, %c0_i32_0 : i32, i32, i32
  }
  func.func @transform_1(%arg0: i32, %arg1: i32) -> (i32, i32, i32) {
    %c0_i32 = arith.constant 0 : i32
    %c0_i32_0 = arith.constant 0 : i32
    %c0_i32_1 = arith.constant 0 : i32
    return %arg1, %c0_i32, %c0_i32_0 : i32, i32, i32
  }
  func.func @transform_2(%arg0: i32, %arg1: i32) -> (i32, i32, i32) {
    %c0_i32 = arith.constant 0 : i32
    %c0_i32_0 = arith.constant 0 : i32
    %c0_i32_1 = arith.constant 0 : i32
    return %arg1, %c0_i32, %c0_i32_0 : i32, i32, i32
  }
  func.func @transform_3(%arg0: i32, %arg1: i32) -> (i32, i32, i32) {
    %c0_i32 = arith.constant 0 : i32
    %c0_i32_0 = arith.constant 0 : i32
    %c0_i32_1 = arith.constant 0 : i32
    return %arg1, %c0_i32, %c0_i32_0 : i32, i32, i32
  }
  func.func @transform_4(%arg0: i32, %arg1: i32) -> (i32, i32, i32) {
    %c0_i32 = arith.constant 0 : i32
    %c0_i32_0 = arith.constant 0 : i32
    %c0_i32_1 = arith.constant 0 : i32
    return %arg1, %c0_i32, %c0_i32_0 : i32, i32, i32
  }
  func.func @transform_5(%arg0: i32, %arg1: i32) -> (i32, i32, i32) {
    %c0_i32 = arith.constant 0 : i32
    %c0_i32_0 = arith.constant 0 : i32
    %c0_i32_1 = arith.constant 0 : i32
    return %arg1, %c0_i32, %c0_i32_0 : i32, i32, i32
  }
  func.func @transform_6(%arg0: i32, %arg1: i32) -> (i32, i32, i32) {
    %c0_i32 = arith.constant 0 : i32
    %c0_i32_0 = arith.constant 0 : i32
    %c0_i32_1 = arith.constant 0 : i32
    return %arg1, %c0_i32, %c0_i32_0 : i32, i32, i32
  }
  func.func @transform_7(%arg0: i32, %arg1: i32) -> (i32, i32, i32) {
    %c0_i32 = arith.constant 0 : i32
    %c0_i32_0 = arith.constant 0 : i32
    %c0_i32_1 = arith.constant 0 : i32
    return %arg1, %c0_i32, %c0_i32_0 : i32, i32, i32
  }
  func.func @transform_8(%arg0: i32, %arg1: i32) -> (i32, i32, i32) {
    %c0_i32 = arith.constant 0 : i32
    %c0_i32_0 = arith.constant 0 : i32
    %c0_i32_1 = arith.constant 0 : i32
    return %arg1, %c0_i32, %c0_i32_0 : i32, i32, i32
  }
  func.func @transform_9(%arg0: i32, %arg1: i32) -> (i32, i32, i32) {
    %c0_i32 = arith.constant 0 : i32
    %c0_i32_0 = arith.constant 0 : i32
    %c0_i32_1 = arith.constant 0 : i32
    return %arg1, %c0_i32, %c0_i32_0 : i32, i32, i32
  }
  func.func @transform_10(%arg0: i32, %arg1: i32) -> (i32, i32, i32) {
    %c0_i32 = arith.constant 0 : i32
    %c0_i32_0 = arith.constant 0 : i32
    %c0_i32_1 = arith.constant 0 : i32
    return %arg1, %c0_i32, %c0_i32_0 : i32, i32, i32
  }
  func.func @transform_11(%arg0: i32, %arg1: i32) -> (i32, i32, i32) {
    %c0_i32 = arith.constant 0 : i32
    %c0_i32_0 = arith.constant 0 : i32
    %c0_i32_1 = arith.constant 0 : i32
    return %arg1, %c0_i32, %c0_i32_0 : i32, i32, i32
  }
  func.func @transform_12(%arg0: i32, %arg1: i32) -> (i32, i32, i32) {
    %c0_i32 = arith.constant 0 : i32
    %c0_i32_0 = arith.constant 0 : i32
    %c0_i32_1 = arith.constant 0 : i32
    return %arg1, %c0_i32, %c0_i32_0 : i32, i32, i32
  }
  func.func @transform_13(%arg0: i32, %arg1: i32) -> (i32, i32, i32) {
    %c0_i32 = arith.constant 0 : i32
    %c0_i32_0 = arith.constant 0 : i32
    %c0_i32_1 = arith.constant 0 : i32
    return %arg1, %c0_i32, %c0_i32_0 : i32, i32, i32
  }
  func.func @transform_14(%arg0: i32, %arg1: i32) -> (i32, i32, i32) {
    %c0_i32 = arith.constant 0 : i32
    %c0_i32_0 = arith.constant 0 : i32
    %c0_i32_1 = arith.constant 0 : i32
    return %arg1, %c0_i32, %c0_i32_0 : i32, i32, i32
  }
  func.func @transform_15(%arg0: i32, %arg1: i32) -> (i32, i32, i32) {
    %c0_i32 = arith.constant 0 : i32
    %c0_i32_0 = arith.constant 0 : i32
    %c0_i32_1 = arith.constant 0 : i32
    return %arg1, %c0_i32, %c0_i32_0 : i32, i32, i32
  }
  func.func @transform_16(%arg0: i32, %arg1: i32) -> (i32, i32, i32) {
    %c0_i32 = arith.constant 0 : i32
    %c0_i32_0 = arith.constant 0 : i32
    %c0_i32_1 = arith.constant 0 : i32
    return %arg1, %c0_i32, %c0_i32_0 : i32, i32, i32
  }
  func.func @transform_17(%arg0: i32, %arg1: i32) -> (i32, i32, i32) {
    %c0_i32 = arith.constant 0 : i32
    %c0_i32_0 = arith.constant 0 : i32
    %c0_i32_1 = arith.constant 0 : i32
    return %arg1, %c0_i32, %c0_i32_0 : i32, i32, i32
  }
  func.func @transform_18(%arg0: i32, %arg1: i32) -> (i32, i32, i32) {
    %c0_i32 = arith.constant 0 : i32
    %c0_i32_0 = arith.constant 0 : i32
    %c0_i32_1 = arith.constant 0 : i32
    return %arg1, %c0_i32, %c0_i32_0 : i32, i32, i32
  }
  func.func @transform_19(%arg0: i32, %arg1: i32) -> (i32, i32, i32) {
    %c0_i32 = arith.constant 0 : i32
    %c0_i32_0 = arith.constant 0 : i32
    %c0_i32_1 = arith.constant 0 : i32
    return %arg0, %c0_i32, %c0_i32_0 : i32, i32, i32
  }
}

</mosaic_0001>

<bundles_post_ra>
// kernel: tpu_custom_call.1
= control target key start
LH: loop header
LB: loop body
LE: loop exit
PB: predicated region body
PF: predicated region fallthrough
CT: control target
= control target key end

     0   :  { %s5660_s0 = inlined_call_operand.hbm [shape: f32[2,8,32], index: 0, kind: input, shape index: {}]   ;;  %s5661_s1 = inlined_call_operand.hbm [shape: f32[2,1,32], index: 1, kind: input, shape index: {}]   ;;  %s5662_s2 = inlined_call_operand.hbm [shape: f32[2,1,32], index: 2, kind: input, shape index: {}]   ;;  %s5663_s3 = inlined_call_operand.hbm [shape: bf16[2,32,96], index: 3, kind: input, shape index: {}]   ;;  %s5664_s4 = inlined_call_operand.hbm [shape: f32[2,1,96], index: 4, kind: input, shape index: {}]   ;;  %s5665_s5 = inlined_call_operand.hbm [shape: bf16[2,32,32], index: 5, kind: input, shape index: {}]   ;;  %s5666_s6 = inlined_call_operand.hbm [shape: f32[2,1,32], index: 6, kind: input, shape index: {}]   ;;  %s5667_s7 = inlined_call_operand.hbm [shape: f32[2,1,32], index: 7, kind: input, shape index: {}]   ;;  %s5668_s8 = inlined_call_operand.hbm [shape: f32[2,1,32], index: 8, kind: input, shape index: {}]   ;;  %s5669_s9 = inlined_call_operand.hbm [shape: bf16[2,32,128], index: 9, kind: input, shape index: {}]   ;;  %s5670_s10 = inlined_call_operand.hbm [shape: f32[2,1,128], index: 10, kind: input, shape index: {}]   ;;  %s5671_s11 = inlined_call_operand.hbm [shape: bf16[2,128,32], index: 11, kind: input, shape index: {}]   ;;  %s5672_s12 = inlined_call_operand.hbm [shape: f32[2,1,32], index: 12, kind: input, shape index: {}]   ;;  %s5673_s13 = inlined_call_operand.hbm [shape: f32[2,1,32], index: 13, kind: input, shape index: {}]   ;;  %s5674_s14 = inlined_call_operand.hbm [shape: f32[2,1,32], index: 14, kind: input, shape index: {}]   ;;  %s5675_s15 = inlined_call_operand.hbm [shape: bf16[2,32,128], index: 15, kind: input, shape index: {}]   ;;  %s5676_s16 = inlined_call_operand.hbm [shape: f32[2,1,128], index: 16, kind: input, shape index: {}]   ;;  %s5677_s17 = inlined_call_operand.hbm [shape: bf16[2,128,32], index: 17, kind: input, shape index: {}]   ;;  %s5678_s18 = inlined_call_operand.hbm [shape: f32[2,1,32], index: 18, kind: input, shape index: {}]   ;;  %s5679_s19 = inlined_call_operand.hbm [shape: f32[2,8,32], index: 19, kind: output, shape index: {}]  }
   0x1   :  { %5730 = sst [smem:[#allocation60_spill]] %s5660_s0 }
   0x2   :  { %5731 = sst [smem:[#allocation61_spill]] %s5661_s1 }
   0x3   :  { %5732 = sst [smem:[#allocation62_spill]] %s5662_s2 }
   0x4   :  { %5733 = sst [smem:[#allocation63_spill]] %s5663_s3 }
   0x5   :  { %5734 = sst [smem:[#allocation64_spill]] %s5664_s4 }
   0x6   :  { %5735 = sst [smem:[#allocation65_spill]] %s5665_s5 }
   0x7   :  { %5736 = sst [smem:[#allocation66_spill]] %s5666_s6 }
   0x8   :  { %5737 = sst [smem:[#allocation67_spill]] %s5667_s7 }
   0x9   :  { %5738 = sst [smem:[#allocation68_spill]] %s5668_s8 }
   0xa   :  { %5739 = sst [smem:[#allocation69_spill]] %s5669_s9 }
   0xb   :  { %5740 = sst [smem:[#allocation70_spill]] %s5670_s10 }
   0xc   :  { %5741 = sst [smem:[#allocation71_spill]] %s5671_s11 }
   0xd   :  { %5742 = sst [smem:[#allocation72_spill]] %s5672_s12 }
   0xe   :  { %5743 = sst [smem:[#allocation73_spill]] %s5674_s14 }
   0xf   :  { %5744 = sst [smem:[#allocation74_spill]] %s5676_s16 }
  0x10   :  { %5745 = sst [smem:[#allocation75_spill]] %s5678_s18 }
  0x11   :  { %5746 = sst [smem:[#allocation76_spill]] %s5679_s19 }
  0x12   :  { %24 = vsyncpa [#allocation3], 0 }
  0x13   :  { %26 = vsyncpa [#allocation3 + $0x1], 0 }
  0x14   :  { %27 = vsyncpa [#allocation6], 0 }
  0x15   :  { %29 = vsyncpa [#allocation6 + $0x1], 0 }
  0x16   :  { %30 = vsyncpa [#allocation9], 0 }
  0x17   :  { %32 = vsyncpa [#allocation9 + $0x1], 0 }
  0x18   :  { %33 = vsyncpa [#allocation12], 0 }
  0x19   :  { %35 = vsyncpa [#allocation12 + $0x1], 0 }
  0x1a   :  { %36 = vsyncpa [#allocation15], 0 }
  0x1b   :  { %38 = vsyncpa [#allocation15 + $0x1], 0 }
  0x1c   :  { %39 = vsyncpa [#allocation18], 0 }
  0x1d   :  { %41 = vsyncpa [#allocation18 + $0x1], 0 }
  0x1e   :  { %42 = vsyncpa [#allocation21], 0 }
  0x1f   :  { %44 = vsyncpa [#allocation21 + $0x1], 0 }
  0x20   :  { %45 = vsyncpa [#allocation24], 0 }
  0x21   :  { %47 = vsyncpa [#allocation24 + $0x1], 0 }
  0x22   :  { %48 = vsyncpa [#allocation27], 0 }
  0x23   :  { %50 = vsyncpa [#allocation27 + $0x1], 0 }
  0x24   :  { %51 = vsyncpa [#allocation30], 0 }
  0x25   :  { %53 = vsyncpa [#allocation30 + $0x1], 0 }
  0x26   :  { %54 = vsyncpa [#allocation4], 0 }
  0x27   :  { %56 = vsyncpa [#allocation4 + $0x1], 0  ;;  %s4595_s0 = smov 0   ;;  %s4597_s30 = smov 0  }
  0x28   :  { %s4599_s20 = smov 0   ;;  %s4601_s21 = smov 0  }
  0x29   :  { %s4603_s1 = smov 0   ;;  %s4605_s22 = smov 0  }
  0x2a   :  { %s4607_s2 = smov 0   ;;  %s4609_s23 = smov 0  }
  0x2b   :  { %s4611_s24 = smov 0   ;;  %s4613_s25 = smov 0  }
  0x2c   :  { %s4615_s3 = smov 0  }
  0x2d LB: > { %5747 = sst [smem:[#allocation44_spill]] %s4433_s30  ;;  %s4651_s26 = sadd.s32 4294967295, %s4469_s3   ;;  %s4469_s3 = sphi %s4615_s3, %s62_s3   ;;  %s4465_s25 = sphi %s4613_s25, %s5847_s25   ;;  %s4461_s24 = sphi %s4611_s24, %s5846_s24   ;;  %s4457_s23 = sphi %s4609_s23, %s5845_s23   ;;  %s4453_s2 = sphi %s4607_s2, %s5844_s2   ;;  %s4449_s22 = sphi %s4605_s22, %s5843_s22   ;;  %s4445_s1 = sphi %s4603_s1, %s5842_s1   ;;  %s4441_s21 = sphi %s4601_s21, %s5838_s21   ;;  %s4437_s20 = sphi %s4599_s20, %s5837_s20   ;;  %s4433_s30 = sphi %s4597_s30, %s5836_s30   ;;  %s4429_s0 = sphi %s4595_s0, %s5835_s0  }
  0x2e   : > { %5748 = sst [smem:[#allocation45_spill]] %s4437_s20  ;;  %s3308_s27 = sadd.s32 4294967294, %s4469_s3  }
  0x2f   : > { %5749 = sst [smem:[#allocation46_spill]] %s4441_s21  ;;  %s71_s28 = sadd.s32 1, %s4461_s24 }
  0x30   : > { %5750 = sst [smem:[#allocation47_spill]] %s4445_s1  ;;  %s74_s29 = sadd.s32 1, %s4465_s25 }
  0x31   : > { %5751 = sst [smem:[#allocation48_spill]] %s4453_s2  ;;  %p72_p0 = scmp.ge.s32.totalorder %s71_s28, 2 }
  0x32   : > { %5752 = sst [smem:[#allocation49_spill]] %s4457_s23  ;;  %s81_s19 = sadd.s32 1, %s4449_s22 }
  0x33   : > { %5753 = sst [smem:[#allocation50_spill]] %s4469_s3  ;;  %p88_p1 = scmp.ne.s32.totalorder %s4449_s22, %s4445_s1 }
  0x34   : > { %5754 = sst [smem:[#allocation51_spill]] %s4651_s26  ;;  %p89_p2 = scmp.eq.s32.totalorder %s4469_s3, 0 }
  0x35   : > { %s5849_s28 = smov (%p72_p0, %s71_s28), 0  ;;  %s5851_s29 = smov (!%p72_p0, %s74_s29), %s4465_s25 }
  0x36   : > { %5755 = sst [smem:[#allocation52_spill]] %s5849_s28  ;;  %p4668_p3 = por %p89_p2, %p88_p1 }
  0x37   : > { %p5692_p4 = scmp.ne.s32.totalorder %s4445_s1, %s4441_s21  ;;  %p76_p5 = scmp.ge.s32.totalorder %s5851_s29, 2 }
  0x38   : > { %s5756_s23 = scalar_select %p4668_p3, 1, 0 }
  0x39   : > { %p95_p6 = scmp.eq.s32.totalorder %s4651_s26, 0  ;;  %s104_s2 = ssub.s32 %s4461_s24, %s5849_s28 }
  0x3a   : > { %s107_s18 = sadd.s32 1, %s4437_s20  ;;  %s5853_s29 = smov (%p76_p5, %s5851_s29), 0 }
  0x3b   : > { %5757 = sst [smem:[#allocation53_spill]] %s5853_s29  ;;  %p4685_p7 = por %p95_p6, %p5692_p4 }
  0x3c   : > { %p105_p8 = scmp.eq.s32.totalorder %s104_s2, 0  ;;  %s78_s14 = ssub.s32 %s4465_s25, %s5853_s29 }
  0x3d   : > { %s5758_s16 = scalar_select %p4685_p7, 1, 0 }
  0x3e   : > { %p114_p9 = scmp.ne.s32.totalorder %s4437_s20, %s4433_s30  ;;  %p79_p10 = scmp.eq.s32.totalorder %s78_s14, 0 }
  0x3f   : > { %5759 = sst [smem:[#allocation54_spill]] %s5758_s16  ;;  %p120_p11 = scmp.ne.s32.totalorder %s4433_s30, %s4429_s0 }
  0x40   : > { %s4696_s12 = scalar_select %p105_p8, %s4437_s20, %s107_s18  }
  0x41   : > { %s4699_s28 = scalar_select %p79_p10, %s4449_s22, %s81_s19  }
  0x42   : > { %5760 = sst [smem:[#allocation55_spill]] %s4696_s12  ;;  %p4703_p12 = por %p114_p9, %p89_p2 }
  0x43   : > { %5761 = sst [smem:[#allocation56_spill]] %s4699_s28  ;;  %p4709_p13 = por %p120_p11, %p95_p6 }
  0x44   : > { %p586_p0 = scmp.eq.s32.totalorder %s4651_s26, 3  ;;  %p592_p5 = scmp.eq.s32.totalorder %s3308_s27, 3 }
  0x45   : > { %s5763_s8 = scalar_select %p4709_p13, 1, 0 }
  0x46   : > { %p4717_p4 = por %p586_p0, %p88_p1  ;;  %p5767_p8 = scmp.ne.s32.totalorder %s4445_s1, %s4441_s21 }
  0x47   : > { %5764 = sst [smem:[#allocation57_spill]] %s5763_s8  ;;  %p3310_p2 = scmp.ge.s32.totalorder %s4469_s3, 4 }
  0x48   : > { %s5765_s14 = scalar_select %p4717_p4, 1, 0 }
  0x49   : > { %p4724_p10 = por %p592_p5, %p5767_p8  ;;  %608 = sbr.rel (%p3310_p2) target bundleno = 567 (0x237), region = 16 }
  0x4a   : > { %5766 = sst [smem:[#allocation58_spill]] %s5765_s14  ;;  %s4730_s19 = sand.u32 (!%p3310_p2), 1, %s4469_s3  }
  0x4b   : > { %s5768_s18 = scalar_select %p4724_p10, 1, 0 }
  0x4c   : > { %s4733_s0 = sand.u32 (!%p3310_p2), 1, %s4437_s20   ;;  %s4736_s2 = sshll.u32 (!%p3310_p2), %s4461_s24, 4 }
  0x4d   : > { %5769 = sst [smem:[#allocation59_spill]] %s5768_s18  ;;  %s633_s27 = scalar_lea.vmem (!%p3310_p2), [#allocation5], %s4733_s0 }
  0x4e   : > { %s640_s29 = sshll.u32 (!%p3310_p2), %s633_s27, 4  ;;  %s5770_s18 = sld [smem:[#allocation61_spill]] (!%p3310_p2)  ;;  %s641_s29 = int_to_ptr.vmem [resolvable:$true] %s640_s29 }
  0x54   : > { %s4743_s21 = scalar_lea.hbm %s5770_s18, %s4736_s2  ;;  %s3783_s27 = scalar_lea.hbm %s5770_s18, 32 }
  0x55   : > { %s3779_s8 = scalar_lea.hbm %s4743_s21, 16  ;;  %p3784_p11 = scmp.lt.u32.totalorder %s4743_s21, %s5770_s18 }
  0x56   : > { %p3780_p1 = scmp.ne.s32.totalorder %s4743_s21, %s3779_s8  ;;  %p3785_p0 = scmp.lt.u32.totalorder %s3783_s27, %s3779_s8 }
  0x57   : > { %p3787_p8 = scmp.lt.u32.totalorder %s3779_s8, %s4743_s21 }
  0x58   : > { %p3781_p6 = pnand %p3780_p1, %p4703_p12  ;;  %p3786_p5 = por %p3785_p0, %p3784_p11 }
  0x5a   : > { %p3782_p9 = pneg %p3781_p6  ;;  %p3788_p2 = por %p3787_p8, %p3786_p5 }
  0x5c   : > { %p3789_p10 = pnand %p3788_p2, %p3782_p9 }
  0x5e   : > { %3792 = shalt.err (!%p3789_p10)
}
  0x5f   : > { %s3793_s12 = scalar_lea.vmem %s641_s29, 16  ;;  %s4471_s28 = smov [#allocation5]  }
  0x60   : > { %p3794_p4 = scmp.ne.s32.totalorder %s641_s29, %s3793_s12  ;;  %s3797_s14 = sshll.u32 %s4471_s28, 4  ;;  %s3798_s14 = int_to_ptr.vmem [resolvable:$false] %s3797_s14 }
  0x61   : > { %s3799_s30 = scalar_lea.vmem %s3798_s14, 32  ;;  %p3800_p13 = scmp.lt.s32.totalorder %s641_s29, %s3798_s14 }
  0x62   : > { %p3795_p1 = pnand %p3794_p4, %p4703_p12  ;;  %p3801_p7 = scmp.lt.s32.totalorder %s3799_s30, %s3793_s12 }
  0x64   : > { %p3796_p6 = pneg %p3795_p1  ;;  %p3802_p3 = por %p3801_p7, %p3800_p13 }
  0x66   : > { %p3803_p0 = pnand %p3802_p3, %p3796_p6 }
  0x68   : > { %3806 = shalt.err (!%p3803_p0)
}
  0x69   : > { %s5771_s8 = scalar_lea.sflag [#allocation6], %s4730_s19  ;;  %s4766_s16 = sshll.u32 %s4733_s0, 4 }
  0x6a   : > { %3579 = dma.hbm_to_vmem [thread:$0]  (%p4703_p12), %s4743_s21, 16, %s641_s29, %s5771_s8  }
  0x6b   : > { %s4769_s20 = sshll.u32 %s4461_s24, 8  ;;  %s5772_s27 = sld [smem:[#allocation63_spill]] }
  0x6c   : > { %s668_s28 = scalar_lea.vmem [#allocation8], %s4766_s16  ;;  %s5715_s21 = scalar_lea.sflag [#allocation9], %s4730_s19 }
  0x6d   : > { %s675_s30 = sshll.u32 %s668_s28, 4  ;;  %s4778_s30 = int_to_ptr.vmem [resolvable:$true] %s675_s30 }
  0x71   : > { %s4775_s12 = scalar_lea.hbm %s5772_s27, %s4769_s20  ;;  %s3811_s26 = scalar_lea.hbm %s5772_s27, 512 }
  0x72   : > { %s3807_s29 = scalar_lea.hbm %s4775_s12, 256  ;;  %p3812_p13 = scmp.lt.u32.totalorder %s4775_s12, %s5772_s27 }
  0x73   : > { %p3808_p3 = scmp.ne.s32.totalorder %s4775_s12, %s3807_s29  ;;  %p3813_p10 = scmp.lt.u32.totalorder %s3811_s26, %s3807_s29 }
  0x74   : > { %p3815_p11 = scmp.lt.u32.totalorder %s3807_s29, %s4775_s12 }
  0x75   : > { %p3809_p4 = pnand %p3808_p3, %p4703_p12  ;;  %p3814_p9 = por %p3813_p10, %p3812_p13 }
  0x77   : > { %p3810_p7 = pneg %p3809_p4  ;;  %p3816_p5 = por %p3815_p11, %p3814_p9 }
  0x79   : > { %p3817_p8 = pnand %p3816_p5, %p3810_p7 }
  0x7b   : > { %3820 = shalt.err (!%p3817_p8)
}
  0x7c   : > { %s3821_s28 = scalar_lea.vmem %s4778_s30, 256  ;;  %s4472_s18 = smov [#allocation8]  }
  0x7d   : > { %p3822_p2 = scmp.ne.s32.totalorder %s4778_s30, %s3821_s28  ;;  %s3825_s8 = sshll.u32 %s4472_s18, 4  ;;  %s3826_s8 = int_to_ptr.vmem [resolvable:$false] %s3825_s8 }
  0x7e   : > { %s3827_s1 = scalar_lea.vmem %s3826_s8, 512  ;;  %p3828_p0 = scmp.lt.s32.totalorder %s4778_s30, %s3826_s8 }
  0x7f   : > { %p3823_p1 = pnand %p3822_p2, %p4703_p12  ;;  %p3829_p3 = scmp.lt.s32.totalorder %s3827_s1, %s3821_s28 }
  0x81   : > { %p3824_p6 = pneg %p3823_p1  ;;  %p3830_p4 = por %p3829_p3, %p3828_p0 }
  0x83   : > { %p3831_p13 = pnand %p3830_p4, %p3824_p6 }
  0x85   : > { %3834 = shalt.err (!%p3831_p13)
}
  0x86   : > { %s5717_s29 = smov 64   ;;  %s4474_s26 = smov 4  }
  0x87   : > { %3581 = dma.hbm_to_vmem [thread:$0]  (%p4703_p12), %s4775_s12, 256, %s4778_s30, %s5715_s21, %s5717_s29, %s5717_s29, %s4474_s26  }
  0x88   : > { %s5773_s5 = sld [smem:[#allocation65_spill]]  ;;  %s706_s8 = scalar_lea.vmem [#allocation11], %s4766_s16 }
  0x89   : > { %s713_s1 = sshll.u32 %s706_s8, 4  ;;  %s5716_s27 = scalar_lea.sflag [#allocation12], %s4730_s19  ;;  %s4814_s1 = int_to_ptr.vmem [resolvable:$true] %s713_s1 }
  0x8e   : > { %s4811_s18 = scalar_lea.hbm %s5773_s5, %s4769_s20  ;;  %s3839_s14 = scalar_lea.hbm %s5773_s5, 512 }
  0x8f   : > { %s3835_s3 = scalar_lea.hbm %s4811_s18, 256  ;;  %p3840_p11 = scmp.lt.u32.totalorder %s4811_s18, %s5773_s5 }
  0x90   : > { %p3836_p7 = scmp.ne.s32.totalorder %s4811_s18, %s3835_s3  ;;  %p3841_p5 = scmp.lt.u32.totalorder %s3839_s14, %s3835_s3 }
  0x91   : > { %p3843_p2 = scmp.lt.u32.totalorder %s3835_s3, %s4811_s18 }
  0x92   : > { %p3837_p10 = pnand %p3836_p7, %p4703_p12  ;;  %p3842_p8 = por %p3841_p5, %p3840_p11 }
  0x94   : > { %p3838_p9 = pneg %p3837_p10  ;;  %p3844_p1 = por %p3843_p2, %p3842_p8 }
  0x96   : > { %p3845_p6 = pnand %p3844_p1, %p3838_p9 }
  0x98   : > { %3848 = shalt.err (!%p3845_p6)
}
  0x99   : > { %s3849_s8 = scalar_lea.vmem %s4814_s1, 256  ;;  %s4475_s12 = smov [#allocation11]  }
  0x9a   : > { %p3850_p0 = scmp.ne.s32.totalorder %s4814_s1, %s3849_s8  ;;  %s3853_s30 = sshll.u32 %s4475_s12, 4  ;;  %s3854_s30 = int_to_ptr.vmem [resolvable:$false] %s3853_s30 }
  0x9b   : > { %s3855_s21 = scalar_lea.vmem %s3854_s30, 512  ;;  %p3856_p13 = scmp.lt.s32.totalorder %s4814_s1, %s3854_s30 }
  0x9c   : > { %p3851_p3 = pnand %p3850_p0, %p4703_p12  ;;  %p3857_p7 = scmp.lt.s32.totalorder %s3855_s21, %s3849_s8 }
  0x9e   : > { %p3852_p4 = pneg %p3851_p3  ;;  %p3858_p10 = por %p3857_p7, %p3856_p13 }
  0xa0   : > { %p3859_p11 = pnand %p3858_p10, %p3852_p4 }
  0xa2   : > { %3862 = shalt.err (!%p3859_p11)
}
  0xa3   : > { %3583 = dma.hbm_to_vmem [thread:$0]  (%p4703_p12), %s4811_s18, 256, %s4814_s1, %s5716_s27, %s5717_s29, %s5717_s29, %s4474_s26  }
  0xa4   : > { %s5774_s7 = sld [smem:[#allocation67_spill]]  ;;  %s743_s8 = scalar_lea.vmem [#allocation14], %s4733_s0 }
  0xa5   : > { %s750_s12 = sshll.u32 %s743_s8, 4  ;;  %s5719_s30 = scalar_lea.sflag [#allocation15], %s4730_s19  ;;  %s751_s12 = int_to_ptr.vmem [resolvable:$true] %s750_s12 }
  0xaa   : > { %s4847_s28 = scalar_lea.hbm %s5774_s7, %s4736_s2  ;;  %s3867_s1 = scalar_lea.hbm %s5774_s7, 32 }
  0xab   : > { %s3863_s21 = scalar_lea.hbm %s4847_s28, 16  ;;  %p3868_p2 = scmp.lt.u32.totalorder %s4847_s28, %s5774_s7 }
  0xac   : > { %p3864_p9 = scmp.ne.s32.totalorder %s4847_s28, %s3863_s21  ;;  %p3869_p1 = scmp.lt.u32.totalorder %s3867_s1, %s3863_s21 }
  0xad   : > { %p3871_p0 = scmp.lt.u32.totalorder %s3863_s21, %s4847_s28 }
  0xae   : > { %p3865_p5 = pnand %p3864_p9, %p4703_p12  ;;  %p3870_p6 = por %p3869_p1, %p3868_p2 }
  0xb0   : > { %p3866_p8 = pneg %p3865_p5  ;;  %p3872_p3 = por %p3871_p0, %p3870_p6 }
  0xb2   : > { %p3873_p4 = pnand %p3872_p3, %p3866_p8 }
  0xb4   : > { %3876 = shalt.err (!%p3873_p4)
}
  0xb5   : > { %s3877_s8 = scalar_lea.vmem %s751_s12, 16  ;;  %s4476_s27 = smov [#allocation14]  }
  0xb6   : > { %p3878_p13 = scmp.ne.s32.totalorder %s751_s12, %s3877_s8  ;;  %s3881_s29 = sshll.u32 %s4476_s27, 4  ;;  %s3882_s29 = int_to_ptr.vmem [resolvable:$false] %s3881_s29 }
  0xb7   : > { %s3883_s5 = scalar_lea.vmem %s3882_s29, 32  ;;  %p3884_p11 = scmp.lt.s32.totalorder %s751_s12, %s3882_s29 }
  0xb8   : > { %p3879_p7 = pnand %p3878_p13, %p4703_p12  ;;  %p3885_p9 = scmp.lt.s32.totalorder %s3883_s5, %s3877_s8 }
  0xba   : > { %p3880_p10 = pneg %p3879_p7  ;;  %p3886_p5 = por %p3885_p9, %p3884_p11 }
  0xbc   : > { %p3887_p1 = pnand %p3886_p5, %p3880_p10 }
  0xbe   : > { %3890 = shalt.err (!%p3887_p1)
}
  0xbf   : > { %3585 = dma.hbm_to_vmem [thread:$0]  (%p4703_p12), %s4847_s28, 16, %s751_s12, %s5719_s30  }
  0xc0   : > { %s5775_s9 = sld [smem:[#allocation69_spill]]  ;;  %s778_s29 = scalar_lea.vmem [#allocation17], %s4766_s16 }
  0xc1   : > { %s785_s1 = sshll.u32 %s778_s29, 4  ;;  %s5721_s3 = sshll.u32 %s4733_s0, 6  ;;  %s4877_s1 = int_to_ptr.vmem [resolvable:$true] %s785_s1 }
  0xc2   : > { %s5720_s14 = scalar_lea.sflag [#allocation18], %s4730_s19 }
  0xc6   : > { %s4874_s18 = scalar_lea.hbm %s5775_s9, %s4769_s20  ;;  %s3895_s5 = scalar_lea.hbm %s5775_s9, 512 }
  0xc7   : > { %s3891_s8 = scalar_lea.hbm %s4874_s18, 256  ;;  %p3896_p0 = scmp.lt.u32.totalorder %s4874_s18, %s5775_s9 }
  0xc8   : > { %p3892_p8 = scmp.ne.s32.totalorder %s4874_s18, %s3891_s8  ;;  %p3897_p3 = scmp.lt.u32.totalorder %s3895_s5, %s3891_s8 }
  0xc9   : > { %p3899_p13 = scmp.lt.u32.totalorder %s3891_s8, %s4874_s18 }
  0xca   : > { %p3893_p2 = pnand %p3892_p8, %p4703_p12  ;;  %p3898_p4 = por %p3897_p3, %p3896_p0 }
  0xcc   : > { %p3894_p6 = pneg %p3893_p2  ;;  %p3900_p7 = por %p3899_p13, %p3898_p4 }
  0xce   : > { %p3901_p10 = pnand %p3900_p7, %p3894_p6 }
  0xd0   : > { %3904 = shalt.err (!%p3901_p10)
}
  0xd1   : > { %s3905_s29 = scalar_lea.vmem %s4877_s1, 256  ;;  %s4477_s28 = smov [#allocation17]  }
  0xd2   : > { %p3906_p11 = scmp.ne.s32.totalorder %s4877_s1, %s3905_s29  ;;  %s3909_s12 = sshll.u32 %s4477_s28, 4  ;;  %s3910_s12 = int_to_ptr.vmem [resolvable:$false] %s3909_s12 }
  0xd3   : > { %s3911_s21 = scalar_lea.vmem %s3910_s12, 512  ;;  %p3912_p1 = scmp.lt.s32.totalorder %s4877_s1, %s3910_s12 }
  0xd4   : > { %p3907_p9 = pnand %p3906_p11, %p4703_p12  ;;  %p3913_p8 = scmp.lt.s32.totalorder %s3911_s21, %s3905_s29 }
  0xd6   : > { %p3908_p5 = pneg %p3907_p9  ;;  %p3914_p2 = por %p3913_p8, %p3912_p1 }
  0xd8   : > { %p3915_p0 = pnand %p3914_p2, %p3908_p5 }
  0xda   : > { %3918 = shalt.err (!%p3915_p0)
}
  0xdb   : > { %s5776_s8 = smov 64   ;;  %s5723_s5 = sshll.u32 %s4461_s24, 10 }
  0xdc   : > { %3587 = dma.hbm_to_vmem [thread:$0]  (%p4703_p12), %s4874_s18, 256, %s4877_s1, %s5720_s14, %s5776_s8, %s5776_s8, %s4474_s26  }
  0xdd   : > { %s5777_s11 = sld [smem:[#allocation71_spill]]  ;;  %s816_s12 = scalar_lea.vmem [#allocation20], %s5721_s3 }
  0xde   : > { %s823_s21 = sshll.u32 %s816_s12, 4  ;;  %s5722_s30 = scalar_lea.sflag [#allocation21], %s4730_s19  ;;  %s4917_s21 = int_to_ptr.vmem [resolvable:$true] %s823_s21 }
  0xe3   : > { %s4913_s28 = scalar_lea.hbm %s5777_s11, %s5723_s5  ;;  %s3923_s27 = scalar_lea.hbm %s5777_s11, 2048 }
  0xe4   : > { %s3919_s7 = scalar_lea.hbm %s4913_s28, 1024  ;;  %p3924_p13 = scmp.lt.u32.totalorder %s4913_s28, %s5777_s11 }
  0xe5   : > { %p3920_p6 = scmp.ne.s32.totalorder %s4913_s28, %s3919_s7  ;;  %p3925_p7 = scmp.lt.u32.totalorder %s3923_s27, %s3919_s7 }
  0xe6   : > { %p3927_p11 = scmp.lt.u32.totalorder %s3919_s7, %s4913_s28 }
  0xe7   : > { %p3921_p3 = pnand %p3920_p6, %p4703_p12  ;;  %p3926_p10 = por %p3925_p7, %p3924_p13 }
  0xe9   : > { %p3922_p4 = pneg %p3921_p3  ;;  %p3928_p9 = por %p3927_p11, %p3926_p10 }
  0xeb   : > { %p3929_p5 = pnand %p3928_p9, %p3922_p4 }
  0xed   : > { %3932 = shalt.err (!%p3929_p5)
}
  0xee   : > { %s3933_s12 = scalar_lea.vmem %s4917_s21, 1024  ;;  %s4478_s18 = smov [#allocation20]  }
  0xef   : > { %p3934_p1 = scmp.ne.s32.totalorder %s4917_s21, %s3933_s12  ;;  %s3937_s1 = sshll.u32 %s4478_s18, 4  ;;  %s3938_s1 = int_to_ptr.vmem [resolvable:$false] %s3937_s1 }
  0xf0   : > { %s3939_s14 = scalar_lea.vmem %s3938_s1, 2048  ;;  %p3940_p0 = scmp.lt.s32.totalorder %s4917_s21, %s3938_s1 }
  0xf1   : > { %p3935_p8 = pnand %p3934_p1, %p4703_p12  ;;  %p3941_p6 = scmp.lt.s32.totalorder %s3939_s14, %s3933_s12 }
  0xf3   : > { %p3936_p2 = pneg %p3935_p8  ;;  %p3942_p3 = por %p3941_p6, %p3940_p0 }
  0xf5   : > { %p3943_p13 = pnand %p3942_p3, %p3936_p2 }
  0xf7   : > { %3946 = shalt.err (!%p3943_p13)
}
  0xf8   : > { %3589 = dma.hbm_to_vmem [thread:$0]  (%p4703_p12), %s4913_s28, 1024, %s4917_s21, %s5722_s30, %s5776_s8, %s5776_s8, %s4474_s26  }
  0xf9   : > { %s4950_s29 = scalar_lea.hbm %s5673_s13, %s4736_s2  ;;  %s853_s12 = scalar_lea.vmem [#allocation23], %s4733_s0 }
  0xfa   : > { %s860_s18 = sshll.u32 %s853_s12, 4  ;;  %s5725_s1 = scalar_lea.sflag [#allocation24], %s4730_s19  ;;  %s861_s18 = int_to_ptr.vmem [resolvable:$true] %s860_s18 }
  0xfb   : > { %s3947_s14 = scalar_lea.hbm %s4950_s29, 16  ;;  %s3951_s21 = scalar_lea.hbm %s5673_s13, 32 }
  0xfc   : > { %p3948_p4 = scmp.ne.s32.totalorder %s4950_s29, %s3947_s14  ;;  %p3952_p11 = scmp.lt.u32.totalorder %s4950_s29, %s5673_s13 }
  0xfd   : > { %p3953_p9 = scmp.lt.u32.totalorder %s3951_s21, %s3947_s14  ;;  %p3955_p1 = scmp.lt.u32.totalorder %s3947_s14, %s4950_s29 }
  0xfe   : > { %p3949_p7 = pnand %p3948_p4, %p4703_p12 }
  0xff   : > { %p3954_p5 = por %p3953_p9, %p3952_p11 }
 0x100   : > { %p3950_p10 = pneg %p3949_p7 }
 0x101   : > { %p3956_p8 = por %p3955_p1, %p3954_p5 }
 0x103   : > { %p3957_p2 = pnand %p3956_p8, %p3950_p10 }
 0x105   : > { %3960 = shalt.err (!%p3957_p2)
}
 0x106   : > { %s3961_s12 = scalar_lea.vmem %s861_s18, 16  ;;  %s4479_s30 = smov [#allocation23]  }
 0x107   : > { %p3962_p0 = scmp.ne.s32.totalorder %s861_s18, %s3961_s12  ;;  %s3965_s5 = sshll.u32 %s4479_s30, 4  ;;  %s3966_s5 = int_to_ptr.vmem [resolvable:$false] %s3965_s5 }
 0x108   : > { %s3967_s3 = scalar_lea.vmem %s3966_s5, 32  ;;  %p3968_p13 = scmp.lt.s32.totalorder %s861_s18, %s3966_s5 }
 0x109   : > { %p3963_p6 = pnand %p3962_p0, %p4703_p12  ;;  %p3969_p4 = scmp.lt.s32.totalorder %s3967_s3, %s3961_s12 }
 0x10b   : > { %p3964_p3 = pneg %p3963_p6  ;;  %p3970_p7 = por %p3969_p4, %p3968_p13 }
 0x10d   : > { %p3971_p9 = pnand %p3970_p7, %p3964_p3 }
 0x10f   : > { %3974 = shalt.err (!%p3971_p9)
}
 0x110   : > { %3591 = dma.hbm_to_vmem [thread:$0]  (%p4703_p12), %s4950_s29, 16, %s861_s18, %s5725_s1  }
 0x111   : > { %s4977_s30 = scalar_lea.hbm %s5675_s15, %s4769_s20  ;;  %s888_s5 = scalar_lea.vmem [#allocation26], %s4766_s16 }
 0x112   : > { %s895_s21 = sshll.u32 %s888_s5, 4  ;;  %s5724_s7 = scalar_lea.sflag [#allocation27], %s4730_s19  ;;  %s4980_s21 = int_to_ptr.vmem [resolvable:$true] %s895_s21 }
 0x113   : > { %s3975_s27 = scalar_lea.hbm %s4977_s30, 256  ;;  %s3979_s12 = scalar_lea.hbm %s5675_s15, 512 }
 0x114   : > { %p3976_p10 = scmp.ne.s32.totalorder %s4977_s30, %s3975_s27  ;;  %p3980_p1 = scmp.lt.u32.totalorder %s4977_s30, %s5675_s15 }
 0x115   : > { %p3981_p8 = scmp.lt.u32.totalorder %s3979_s12, %s3975_s27  ;;  %p3983_p0 = scmp.lt.u32.totalorder %s3975_s27, %s4977_s30 }
 0x116   : > { %p3977_p11 = pnand %p3976_p10, %p4703_p12 }
 0x117   : > { %p3982_p2 = por %p3981_p8, %p3980_p1 }
 0x118   : > { %p3978_p5 = pneg %p3977_p11 }
 0x119   : > { %p3984_p6 = por %p3983_p0, %p3982_p2 }
 0x11b   : > { %p3985_p3 = pnand %p3984_p6, %p3978_p5 }
 0x11d   : > { %3988 = shalt.err (!%p3985_p3)
}
 0x11e   : > { %s3989_s16 = scalar_lea.vmem %s4980_s21, 256  ;;  %s4480_s14 = smov [#allocation26]  }
 0x11f   : > { %p3990_p13 = scmp.ne.s32.totalorder %s4980_s21, %s3989_s16  ;;  %s3993_s28 = sshll.u32 %s4480_s14, 4  ;;  %s3994_s28 = int_to_ptr.vmem [resolvable:$false] %s3993_s28 }
 0x120   : > { %s3995_s5 = scalar_lea.vmem %s3994_s28, 512  ;;  %p3996_p9 = scmp.lt.s32.totalorder %s4980_s21, %s3994_s28 }
 0x121   : > { %p3991_p4 = pnand %p3990_p13, %p4703_p12  ;;  %p3997_p10 = scmp.lt.s32.totalorder %s3995_s5, %s3989_s16 }
 0x123   : > { %p3992_p7 = pneg %p3991_p4  ;;  %p3998_p11 = por %p3997_p10, %p3996_p9 }
 0x125   : > { %p3999_p1 = pnand %p3998_p11, %p3992_p7 }
 0x127   : > { %4002 = shalt.err (!%p3999_p1)
}
 0x128   : > { %3593 = dma.hbm_to_vmem [thread:$0]  (%p4703_p12), %s4977_s30, 256, %s4980_s21, %s5724_s7, %s5776_s8, %s5776_s8, %s4474_s26  }
 0x129   : > { %s5778_s27 = sshll.u32 %s4461_s24, 10  ;;  %s5779_s20 = sshll.u32 %s4733_s0, 6 }
 0x12a   : > { %s5014_s12 = scalar_lea.hbm %s5677_s17, %s5778_s27  ;;  %s926_s3 = scalar_lea.vmem [#allocation29], %s5779_s20 }
 0x12b   : > { %s933_s16 = sshll.u32 %s926_s3, 4  ;;  %s612_s14 = sand.u32 1, %s4449_s22   ;;  %s5019_s16 = int_to_ptr.vmem [resolvable:$true] %s933_s16 }
 0x12c   : > { %s5726_s28 = scalar_lea.sflag [#allocation30], %s4730_s19  ;;  %s4003_s5 = scalar_lea.hbm %s5014_s12, 1024 }
 0x12d   : > { %p4004_p5 = scmp.ne.s32.totalorder %s5014_s12, %s4003_s5  ;;  %s4007_s27 = scalar_lea.hbm %s5677_s17, 2048 }
 0x12e   : > { %p4008_p0 = scmp.lt.u32.totalorder %s5014_s12, %s5677_s17  ;;  %p4009_p6 = scmp.lt.u32.totalorder %s4007_s27, %s4003_s5 }
 0x12f   : > { %p4005_p8 = pnand %p4004_p5, %p4703_p12  ;;  %p4011_p13 = scmp.lt.u32.totalorder %s4003_s5, %s5014_s12 }
 0x130   : > { %p4010_p3 = por %p4009_p6, %p4008_p0 }
 0x131   : > { %p4006_p2 = pneg %p4005_p8 }
 0x132   : > { %p4012_p4 = por %p4011_p13, %p4010_p3 }
 0x134   : > { %p4013_p7 = pnand %p4012_p4, %p4006_p2 }
 0x136   : > { %4016 = shalt.err (!%p4013_p7)
}
 0x137   : > { %s4017_s20 = scalar_lea.vmem %s5019_s16, 1024  ;;  %s4481_s3 = smov [#allocation29]  }
 0x138   : > { %p4018_p9 = scmp.ne.s32.totalorder %s5019_s16, %s4017_s20  ;;  %s4021_s30 = sshll.u32 %s4481_s3, 4  ;;  %s4022_s30 = int_to_ptr.vmem [resolvable:$false] %s4021_s30 }
 0x139   : > { %s4023_s21 = scalar_lea.vmem %s4022_s30, 2048  ;;  %p4024_p1 = scmp.lt.s32.totalorder %s5019_s16, %s4022_s30 }
 0x13a   : > { %p4019_p10 = pnand %p4018_p9, %p4703_p12  ;;  %p4025_p5 = scmp.lt.s32.totalorder %s4023_s21, %s4017_s20 }
 0x13c   : > { %p4020_p11 = pneg %p4019_p10  ;;  %p4026_p8 = por %p4025_p5, %p4024_p1 }
 0x13e   : > { %p4027_p0 = pnand %p4026_p8, %p4020_p11 }
 0x140   : > { %4030 = shalt.err (!%p4027_p0)
}
 0x141   : > { %3595 = dma.hbm_to_vmem [thread:$0]  (%p4703_p12), %s5014_s12, 1024, %s5019_s16, %s5726_s28, %s5776_s8, %s5776_s8, %s4474_s26  }
 0x142   : > { %s3311_s5 = sshll.u32 %s612_s14, 3  ;;  %s3312_s27 = sshll.u32 %s4465_s25, 7 }
 0x143   : > { %s5780_s20 = sld [smem:[#allocation60_spill]]  ;;  %s616_s30 = scalar_lea.vmem [#allocation2], %s3311_s5 }
 0x144   : > { %s623_s21 = sshll.u32 %s616_s30, 4  ;;  %s5782_s11 = sld [smem:[#allocation62_spill]]  ;;  %s5056_s21 = int_to_ptr.vmem [resolvable:$true] %s623_s21 }
 0x145   : > { %s613_s8 = scalar_lea.sflag [#allocation3], %s612_s14  ;;  %p5783_p6 = scmp.ne.s32.totalorder %s5756_s23, 0 }
 0x149   : > { %s5781_s7 = smov %s5780_s20  ;;  %s5054_s3 = scalar_lea.hbm %s5780_s20, %s3312_s27 }
 0x14a   : > { %s5062_s26 = scalar_lea.hbm %s5782_s11, %s4736_s2  ;;  %s4031_s12 = scalar_lea.hbm %s5054_s3, 128 }
 0x14b   : > { %p4032_p2 = scmp.ne.s32.totalorder %s5054_s3, %s4031_s12  ;;  %s4035_s29 = scalar_lea.hbm %s5781_s7, 256 }
 0x14c   : > { %p4036_p4 = scmp.lt.u32.totalorder %s5054_s3, %s5781_s7  ;;  %p4037_p7 = scmp.lt.u32.totalorder %s4035_s29, %s4031_s12 }
 0x14d   : > { %p4033_p3 = pnand %p4032_p2, %p5783_p6  ;;  %p4039_p10 = scmp.lt.u32.totalorder %s4031_s12, %s5054_s3 }
 0x14e   : > { %p4038_p9 = por %p4037_p7, %p4036_p4 }
 0x14f   : > { %p4034_p13 = pneg %p4033_p3 }
 0x150   : > { %p4040_p11 = por %p4039_p10, %p4038_p9 }
 0x152   : > { %p4041_p1 = pnand %p4040_p11, %p4034_p13 }
 0x154   : > { %4044 = shalt.err (!%p4041_p1)
}
 0x155   : > { %s4045_s9 = scalar_lea.vmem %s5056_s21, 128  ;;  %s4482_s1 = smov [#allocation2]  }
 0x156   : > { %p4046_p5 = scmp.ne.s32.totalorder %s5056_s21, %s4045_s9  ;;  %s4049_s14 = sshll.u32 %s4482_s1, 4  ;;  %s4050_s14 = int_to_ptr.vmem [resolvable:$false] %s4049_s14 }
 0x157   : > { %s4051_s20 = scalar_lea.vmem %s4050_s14, 256  ;;  %p4052_p2 = scmp.lt.s32.totalorder %s5056_s21, %s4050_s14 }
 0x158   : > { %p4047_p8 = pnand %p4046_p5, %p5783_p6  ;;  %p4053_p3 = scmp.lt.s32.totalorder %s4051_s20, %s4045_s9 }
 0x15a   : > { %p4048_p0 = pneg %p4047_p8  ;;  %p4054_p4 = por %p4053_p3, %p4052_p2 }
 0x15c   : > { %p4055_p7 = pnand %p4054_p4, %p4048_p0 }
 0x15e   : > { %4058 = shalt.err (!%p4055_p7)
}
 0x15f   : > { %3578 = dma.hbm_to_vmem [thread:$0]  (%p5783_p6), %s5054_s3, 128, %s5056_s21, %s613_s8  }
 0x160   : > { %s650_s30 = scalar_lea.vmem [#allocation7], %s4733_s0  ;;  %s5784_s4 = sld [smem:[#allocation64_spill]] }
 0x161   : > { %s657_s12 = sshll.u32 %s650_s30, 4  ;;  %s4059_s5 = scalar_lea.hbm %s5062_s26, 16  ;;  %s658_s12 = int_to_ptr.vmem [resolvable:$true] %s657_s12 }
 0x162   : > { %p4060_p13 = scmp.ne.s32.totalorder %s5062_s26, %s4059_s5  ;;  %s4063_s9 = scalar_lea.hbm %s5782_s11, 32 }
 0x163   : > { %p4064_p6 = scmp.lt.u32.totalorder %s5062_s26, %s5782_s11  ;;  %p4065_p11 = scmp.lt.u32.totalorder %s4063_s9, %s4059_s5 }
 0x164   : > { %p4061_p9 = pnand %p4060_p13, %p4703_p12  ;;  %p4067_p5 = scmp.lt.u32.totalorder %s4059_s5, %s5062_s26 }
 0x165   : > { %p4066_p1 = por %p4065_p11, %p4064_p6 }
 0x166   : > { %s5092_s29 = scalar_lea.hbm %s5784_s4, %s4736_s2  ;;  %p4062_p10 = pneg %p4061_p9 }
 0x167   : > { %p4068_p8 = por %p4067_p5, %p4066_p1 }
 0x169   : > { %p4069_p0 = pnand %p4068_p8, %p4062_p10 }
 0x16b   : > { %4072 = shalt.err (!%p4069_p0)
}
 0x16c   : > { %s4073_s3 = scalar_lea.vmem %s658_s12, 16  ;;  %s4483_s21 = smov [#allocation7]  }
 0x16d   : > { %p4074_p2 = scmp.ne.s32.totalorder %s658_s12, %s4073_s3  ;;  %s4077_s8 = sshll.u32 %s4483_s21, 4  ;;  %s4078_s8 = int_to_ptr.vmem [resolvable:$false] %s4077_s8 }
 0x16e   : > { %s4079_s20 = scalar_lea.vmem %s4078_s8, 32  ;;  %p4080_p7 = scmp.lt.s32.totalorder %s658_s12, %s4078_s8 }
 0x16f   : > { %p4075_p3 = pnand %p4074_p2, %p4703_p12  ;;  %p4081_p13 = scmp.lt.s32.totalorder %s4079_s20, %s4073_s3 }
 0x171   : > { %p4076_p4 = pneg %p4075_p3  ;;  %p4082_p9 = por %p4081_p13, %p4080_p7 }
 0x173   : > { %p4083_p6 = pnand %p4082_p9, %p4076_p4 }
 0x175   : > { %4086 = shalt.err (!%p4083_p6)
}
 0x176   : > { %s5785_s30 = scalar_lea.sflag [#allocation6], %s4730_s19  ;;  %s688_s16 = scalar_lea.vmem [#allocation10], %s4733_s0 }
 0x177   : > { %3580 = dma.hbm_to_vmem [thread:$0]  (%p4703_p12), %s5062_s26, 16, %s658_s12, %s5785_s30  }
 0x178   : > { %s695_s27 = sshll.u32 %s688_s16, 4  ;;  %s5786_s6 = sld [smem:[#allocation66_spill]]  ;;  %s696_s27 = int_to_ptr.vmem [resolvable:$true] %s695_s27 }
 0x179   : > { %s4087_s9 = scalar_lea.hbm %s5092_s29, 16  ;;  %s4091_s3 = scalar_lea.hbm %s5784_s4, 32 }
 0x17a   : > { %p4088_p10 = scmp.ne.s32.totalorder %s5092_s29, %s4087_s9  ;;  %p4092_p5 = scmp.lt.u32.totalorder %s5092_s29, %s5784_s4 }
 0x17b   : > { %p4093_p8 = scmp.lt.u32.totalorder %s4091_s3, %s4087_s9  ;;  %p4095_p2 = scmp.lt.u32.totalorder %s4087_s9, %s5092_s29 }
 0x17c   : > { %p4089_p11 = pnand %p4088_p10, %p4703_p12 }
 0x17d   : > { %p4094_p0 = por %p4093_p8, %p4092_p5 }
 0x17e   : > { %s5118_s18 = scalar_lea.hbm %s5786_s6, %s4736_s2  ;;  %p4090_p1 = pneg %p4089_p11 }
 0x17f   : > { %p4096_p3 = por %p4095_p2, %p4094_p0 }
 0x181   : > { %p4097_p4 = pnand %p4096_p3, %p4090_p1 }
 0x183   : > { %4100 = shalt.err (!%p4097_p4)
}
 0x184   : > { %s4101_s26 = scalar_lea.vmem %s696_s27, 16  ;;  %s4484_s12 = smov [#allocation10]  }
 0x185   : > { %p4102_p7 = scmp.ne.s32.totalorder %s696_s27, %s4101_s26  ;;  %s4105_s20 = sshll.u32 %s4484_s12, 4  ;;  %s4106_s20 = int_to_ptr.vmem [resolvable:$false] %s4105_s20 }
 0x186   : > { %s4107_s30 = scalar_lea.vmem %s4106_s20, 32  ;;  %p4108_p6 = scmp.lt.s32.totalorder %s696_s27, %s4106_s20 }
 0x187   : > { %p4103_p13 = pnand %p4102_p7, %p4703_p12  ;;  %p4109_p10 = scmp.lt.s32.totalorder %s4107_s30, %s4101_s26 }
 0x189   : > { %p4104_p9 = pneg %p4103_p13  ;;  %p4110_p11 = por %p4109_p10, %p4108_p6 }
 0x18b   : > { %p4111_p5 = pnand %p4110_p11, %p4104_p9 }
 0x18d   : > { %4114 = shalt.err (!%p4111_p5)
}
 0x18e   : > { %s5787_s16 = scalar_lea.sflag [#allocation9], %s4730_s19  ;;  %s726_s5 = scalar_lea.vmem [#allocation13], %s4733_s0 }
 0x18f   : > { %3582 = dma.hbm_to_vmem [thread:$0]  (%p4703_p12), %s5092_s29, 16, %s696_s27, %s5787_s16  }
 0x190   : > { %s733_s23 = sshll.u32 %s726_s5, 4  ;;  %s5788_s14 = sld [smem:[#allocation68_spill]]  ;;  %s734_s23 = int_to_ptr.vmem [resolvable:$true] %s733_s23 }
 0x191   : > { %s4115_s21 = scalar_lea.hbm %s5118_s18, 16  ;;  %s4119_s12 = scalar_lea.hbm %s5786_s6, 32 }
 0x192   : > { %p4116_p1 = scmp.ne.s32.totalorder %s5118_s18, %s4115_s21  ;;  %p4120_p2 = scmp.lt.u32.totalorder %s5118_s18, %s5786_s6 }
 0x193   : > { %p4121_p3 = scmp.lt.u32.totalorder %s4119_s12, %s4115_s21  ;;  %p4123_p7 = scmp.lt.u32.totalorder %s4115_s21, %s5118_s18 }
 0x194   : > { %p4117_p8 = pnand %p4116_p1, %p4703_p12 }
 0x195   : > { %p4122_p4 = por %p4121_p3, %p4120_p2 }
 0x196   : > { %s5144_s3 = scalar_lea.hbm %s5788_s14, %s4736_s2  ;;  %p4118_p0 = pneg %p4117_p8 }
 0x197   : > { %p4124_p13 = por %p4123_p7, %p4122_p4 }
 0x199   : > { %p4125_p9 = pnand %p4124_p13, %p4118_p0 }
 0x19b   : > { %4128 = shalt.err (!%p4125_p9)
}
 0x19c   : > { %s4129_s29 = scalar_lea.vmem %s734_s23, 16  ;;  %s4485_s27 = smov [#allocation13]  }
 0x19d   : > { %p4130_p6 = scmp.ne.s32.totalorder %s734_s23, %s4129_s29  ;;  %s4133_s16 = sshll.u32 %s4485_s27, 4  ;;  %s4134_s16 = int_to_ptr.vmem [resolvable:$false] %s4133_s16 }
 0x19e   : > { %s4135_s5 = scalar_lea.vmem %s4134_s16, 32  ;;  %p4136_p5 = scmp.lt.s32.totalorder %s734_s23, %s4134_s16 }
 0x19f   : > { %p4131_p10 = pnand %p4130_p6, %p4703_p12  ;;  %p4137_p1 = scmp.lt.s32.totalorder %s4135_s5, %s4129_s29 }
 0x1a1   : > { %p4132_p11 = pneg %p4131_p10  ;;  %p4138_p8 = por %p4137_p1, %p4136_p5 }
 0x1a3   : > { %p4139_p2 = pnand %p4138_p8, %p4132_p11 }
 0x1a5   : > { %4142 = shalt.err (!%p4139_p2)
}
 0x1a6   : > { %s5789_s9 = scalar_lea.sflag [#allocation12], %s4730_s19  ;;  %s760_s1 = scalar_lea.vmem [#allocation16], %s4733_s0 }
 0x1a7   : > { %3584 = dma.hbm_to_vmem [thread:$0]  (%p4703_p12), %s5118_s18, 16, %s734_s23, %s5789_s9  }
 0x1a8   : > { %s767_s21 = sshll.u32 %s760_s1, 4  ;;  %s5790_s12 = sld [smem:[#allocation70_spill]]  ;;  %s768_s21 = int_to_ptr.vmem [resolvable:$true] %s767_s21 }
 0x1a9   : > { %s4143_s30 = scalar_lea.hbm %s5144_s3, 16  ;;  %s4147_s16 = scalar_lea.hbm %s5788_s14, 32 }
 0x1aa   : > { %p4144_p0 = scmp.ne.s32.totalorder %s5144_s3, %s4143_s30  ;;  %p4148_p7 = scmp.lt.u32.totalorder %s5144_s3, %s5788_s14 }
 0x1ab   : > { %p4149_p13 = scmp.lt.u32.totalorder %s4147_s16, %s4143_s30  ;;  %p4151_p6 = scmp.lt.u32.totalorder %s4143_s30, %s5144_s3 }
 0x1ac   : > { %p4145_p3 = pnand %p4144_p0, %p4703_p12 }
 0x1ad   : > { %p4150_p9 = por %p4149_p13, %p4148_p7 }
 0x1ae   : > { %s5170_s20 = scalar_lea.hbm %s5790_s12, %s4736_s2  ;;  %p4146_p4 = pneg %p4145_p3 }
 0x1af   : > { %p4152_p10 = por %p4151_p6, %p4150_p9 }
 0x1b1   : > { %p4153_p11 = pnand %p4152_p10, %p4146_p4 }
 0x1b3   : > { %4156 = shalt.err (!%p4153_p11)
}
 0x1b4   : > { %s4157_s18 = scalar_lea.vmem %s768_s21, 16  ;;  %s4486_s23 = smov [#allocation16]  }
 0x1b5   : > { %p4158_p5 = scmp.ne.s32.totalorder %s768_s21, %s4157_s18  ;;  %s4161_s9 = sshll.u32 %s4486_s23, 4  ;;  %s4162_s9 = int_to_ptr.vmem [resolvable:$false] %s4161_s9 }
 0x1b6   : > { %s4163_s1 = scalar_lea.vmem %s4162_s9, 32  ;;  %p4164_p2 = scmp.lt.s32.totalorder %s768_s21, %s4162_s9 }
 0x1b7   : > { %p4159_p1 = pnand %p4158_p5, %p4703_p12  ;;  %p4165_p0 = scmp.lt.s32.totalorder %s4163_s1, %s4157_s18 }
 0x1b9   : > { %p4160_p8 = pneg %p4159_p1  ;;  %p4166_p3 = por %p4165_p0, %p4164_p2 }
 0x1bb   : > { %p4167_p7 = pnand %p4166_p3, %p4160_p8 }
 0x1bd   : > { %4170 = shalt.err (!%p4167_p7)
}
 0x1be   : > { %s5791_s28 = scalar_lea.sflag [#allocation15], %s4730_s19  ;;  %s798_s8 = scalar_lea.vmem [#allocation19], %s4733_s0 }
 0x1bf   : > { %3586 = dma.hbm_to_vmem [thread:$0]  (%p4703_p12), %s5144_s3, 16, %s768_s21, %s5791_s28  }
 0x1c0   : > { %s805_s26 = sshll.u32 %s798_s8, 4  ;;  %s5792_s27 = sld [smem:[#allocation72_spill]]  ;;  %s806_s26 = int_to_ptr.vmem [resolvable:$true] %s805_s26 }
 0x1c1   : > { %s4171_s5 = scalar_lea.hbm %s5170_s20, 16  ;;  %s4175_s9 = scalar_lea.hbm %s5790_s12, 32 }
 0x1c2   : > { %p4172_p4 = scmp.ne.s32.totalorder %s5170_s20, %s4171_s5  ;;  %p4176_p6 = scmp.lt.u32.totalorder %s5170_s20, %s5790_s12 }
 0x1c3   : > { %p4177_p10 = scmp.lt.u32.totalorder %s4175_s9, %s4171_s5  ;;  %p4179_p5 = scmp.lt.u32.totalorder %s4171_s5, %s5170_s20 }
 0x1c4   : > { %p4173_p13 = pnand %p4172_p4, %p4703_p12 }
 0x1c5   : > { %p4178_p11 = por %p4177_p10, %p4176_p6 }
 0x1c6   : > { %s5196_s16 = scalar_lea.hbm %s5792_s27, %s4736_s2  ;;  %p4174_p9 = pneg %p4173_p13 }
 0x1c7   : > { %p4180_p1 = por %p4179_p5, %p4178_p11 }
 0x1c9   : > { %p4181_p8 = pnand %p4180_p1, %p4174_p9 }
 0x1cb   : > { %4184 = shalt.err (!%p4181_p8)
}
 0x1cc   : > { %s4185_s3 = scalar_lea.vmem %s806_s26, 16  ;;  %s4487_s21 = smov [#allocation19]  }
 0x1cd   : > { %p4186_p2 = scmp.ne.s32.totalorder %s806_s26, %s4185_s3  ;;  %s4189_s28 = sshll.u32 %s4487_s21, 4  ;;  %s4190_s28 = int_to_ptr.vmem [resolvable:$false] %s4189_s28 }
 0x1ce   : > { %s4191_s8 = scalar_lea.vmem %s4190_s28, 32  ;;  %p4192_p7 = scmp.lt.s32.totalorder %s806_s26, %s4190_s28 }
 0x1cf   : > { %p4187_p0 = pnand %p4186_p2, %p4703_p12  ;;  %p4193_p4 = scmp.lt.s32.totalorder %s4191_s8, %s4185_s3 }
 0x1d1   : > { %p4188_p3 = pneg %p4187_p0  ;;  %p4194_p13 = por %p4193_p4, %p4192_p7 }
 0x1d3   : > { %p4195_p6 = pnand %p4194_p13, %p4188_p3 }
 0x1d5   : > { %4198 = shalt.err (!%p4195_p6)
}
 0x1d6   : > { %s5793_s4 = scalar_lea.sflag [#allocation18], %s4730_s19  ;;  %s836_s30 = scalar_lea.vmem [#allocation22], %s4733_s0 }
 0x1d7   : > { %3588 = dma.hbm_to_vmem [thread:$0]  (%p4703_p12), %s5170_s20, 16, %s806_s26, %s5793_s4  }
 0x1d8   : > { %s843_s29 = sshll.u32 %s836_s30, 4  ;;  %s5794_s23 = sld [smem:[#allocation73_spill]]  ;;  %s844_s29 = int_to_ptr.vmem [resolvable:$true] %s843_s29 }
 0x1d9   : > { %s4199_s3 = scalar_lea.hbm %s5196_s16, 16  ;;  %s4203_s8 = scalar_lea.hbm %s5792_s27, 32 }
 0x1da   : > { %p4200_p9 = scmp.ne.s32.totalorder %s5196_s16, %s4199_s3  ;;  %p4204_p5 = scmp.lt.u32.totalorder %s5196_s16, %s5792_s27 }
 0x1db   : > { %p4205_p1 = scmp.lt.u32.totalorder %s4203_s8, %s4199_s3  ;;  %p4207_p2 = scmp.lt.u32.totalorder %s4199_s3, %s5196_s16 }
 0x1dc   : > { %p4201_p10 = pnand %p4200_p9, %p4703_p12 }
 0x1dd   : > { %p4206_p8 = por %p4205_p1, %p4204_p5 }
 0x1de   : > { %s5795_s9 = smov %s5794_s23  ;;  %s5222_s1 = scalar_lea.hbm %s5794_s23, %s4736_s2 }
 0x1df   : > { %p4202_p11 = pneg %p4201_p10  ;;  %p4208_p0 = por %p4207_p2, %p4206_p8 }
 0x1e1   : > { %p4209_p3 = pnand %p4208_p0, %p4202_p11 }
 0x1e3   : > { %4212 = shalt.err (!%p4209_p3)
}
 0x1e4   : > { %s4213_s20 = scalar_lea.vmem %s844_s29, 16  ;;  %s4488_s26 = smov [#allocation22]  }
 0x1e5   : > { %p4214_p7 = scmp.ne.s32.totalorder %s844_s29, %s4213_s20  ;;  %s4217_s4 = sshll.u32 %s4488_s26, 4  ;;  %s4218_s4 = int_to_ptr.vmem [resolvable:$false] %s4217_s4 }
 0x1e6   : > { %s4219_s30 = scalar_lea.vmem %s4218_s4, 32  ;;  %p4220_p6 = scmp.lt.s32.totalorder %s844_s29, %s4218_s4 }
 0x1e7   : > { %p4215_p4 = pnand %p4214_p7, %p4703_p12  ;;  %p4221_p9 = scmp.lt.s32.totalorder %s4219_s30, %s4213_s20 }
 0x1e9   : > { %p4216_p13 = pneg %p4215_p4  ;;  %p4222_p10 = por %p4221_p9, %p4220_p6 }
 0x1eb   : > { %p4223_p1 = pnand %p4222_p10, %p4216_p13 }
 0x1ed   : > { %4226 = shalt.err (!%p4223_p1)
}
 0x1ee   : > { %s5796_s6 = scalar_lea.sflag [#allocation21], %s4730_s19  ;;  %s870_s7 = scalar_lea.vmem [#allocation25], %s4733_s0 }
 0x1ef   : > { %3590 = dma.hbm_to_vmem [thread:$0]  (%p4703_p12), %s5196_s16, 16, %s844_s29, %s5796_s6  }
 0x1f0   : > { %s877_s5 = sshll.u32 %s870_s7, 4  ;;  %s5797_s3 = sld [smem:[#allocation74_spill]]  ;;  %s878_s5 = int_to_ptr.vmem [resolvable:$true] %s877_s5 }
 0x1f1   : > { %s4227_s8 = scalar_lea.hbm %s5222_s1, 16  ;;  %s4231_s4 = scalar_lea.hbm %s5795_s9, 32 }
 0x1f2   : > { %p4228_p11 = scmp.ne.s32.totalorder %s5222_s1, %s4227_s8  ;;  %p4232_p2 = scmp.lt.u32.totalorder %s5222_s1, %s5795_s9 }
 0x1f3   : > { %p4233_p0 = scmp.lt.u32.totalorder %s4231_s4, %s4227_s8  ;;  %p4235_p7 = scmp.lt.u32.totalorder %s4227_s8, %s5222_s1 }
 0x1f4   : > { %p4229_p5 = pnand %p4228_p11, %p4703_p12 }
 0x1f5   : > { %p4234_p3 = por %p4233_p0, %p4232_p2 }
 0x1f6   : > { %s5798_s28 = smov %s5797_s3  ;;  %s5248_s21 = scalar_lea.hbm %s5797_s3, %s4736_s2 }
 0x1f7   : > { %p4230_p8 = pneg %p4229_p5  ;;  %p4236_p4 = por %p4235_p7, %p4234_p3 }
 0x1f9   : > { %p4237_p13 = pnand %p4236_p4, %p4230_p8 }
 0x1fb   : > { %4240 = shalt.err (!%p4237_p13)
}
 0x1fc   : > { %s4241_s16 = scalar_lea.vmem %s878_s5, 16  ;;  %s4489_s29 = smov [#allocation25]  }
 0x1fd   : > { %p4242_p6 = scmp.ne.s32.totalorder %s878_s5, %s4241_s16  ;;  %s4245_s6 = sshll.u32 %s4489_s29, 4  ;;  %s4246_s6 = int_to_ptr.vmem [resolvable:$false] %s4245_s6 }
 0x1fe   : > { %s4247_s7 = scalar_lea.vmem %s4246_s6, 32  ;;  %p4248_p1 = scmp.lt.s32.totalorder %s878_s5, %s4246_s6 }
 0x1ff   : > { %p4243_p9 = pnand %p4242_p6, %p4703_p12  ;;  %p4249_p11 = scmp.lt.s32.totalorder %s4247_s7, %s4241_s16 }
 0x201   : > { %p4244_p10 = pneg %p4243_p9  ;;  %p4250_p5 = por %p4249_p11, %p4248_p1 }
 0x203   : > { %p4251_p0 = pnand %p4250_p5, %p4244_p10 }
 0x205   : > { %4254 = shalt.err (!%p4251_p0)
}
 0x206   : > { %s5799_s11 = scalar_lea.sflag [#allocation24], %s4730_s19  ;;  %s908_s18 = scalar_lea.vmem [#allocation28], %s4733_s0 }
 0x207   : > { %3592 = dma.hbm_to_vmem [thread:$0]  (%p4703_p12), %s5222_s1, 16, %s878_s5, %s5799_s11  }
 0x208   : > { %s915_s23 = sshll.u32 %s908_s18, 4  ;;  %s5800_s20 = sld [smem:[#allocation75_spill]]  ;;  %s916_s23 = int_to_ptr.vmem [resolvable:$true] %s915_s23 }
 0x209   : > { %s4255_s30 = scalar_lea.hbm %s5248_s21, 16  ;;  %s4259_s6 = scalar_lea.hbm %s5798_s28, 32 }
 0x20a   : > { %p4256_p8 = scmp.ne.s32.totalorder %s5248_s21, %s4255_s30  ;;  %p4260_p7 = scmp.lt.u32.totalorder %s5248_s21, %s5798_s28 }
 0x20b   : > { %p4261_p4 = scmp.lt.u32.totalorder %s4259_s6, %s4255_s30  ;;  %p4263_p6 = scmp.lt.u32.totalorder %s4255_s30, %s5248_s21 }
 0x20c   : > { %p4257_p2 = pnand %p4256_p8, %p4703_p12 }
 0x20d   : > { %p4262_p13 = por %p4261_p4, %p4260_p7 }
 0x20e   : > { %s5801_s26 = smov %s5800_s20  ;;  %s5274_s4 = scalar_lea.hbm %s5800_s20, %s4736_s2 }
 0x20f   : > { %p4258_p3 = pneg %p4257_p2  ;;  %p4264_p9 = por %p4263_p6, %p4262_p13 }
 0x211   : > { %p4265_p10 = pnand %p4264_p9, %p4258_p3 }
 0x213   : > { %4268 = shalt.err (!%p4265_p10)
}
 0x214   : > { %s4269_s2 = scalar_lea.vmem %s916_s23, 16  ;;  %s4490_s1 = smov [#allocation28]  }
 0x215   : > { %p4270_p1 = scmp.ne.s32.totalorder %s916_s23, %s4269_s2  ;;  %s4273_s5 = sshll.u32 %s4490_s1, 4  ;;  %s4274_s5 = int_to_ptr.vmem [resolvable:$false] %s4273_s5 }
 0x216   : > { %s4275_s11 = scalar_lea.vmem %s4274_s5, 32  ;;  %p4276_p0 = scmp.lt.s32.totalorder %s916_s23, %s4274_s5 }
 0x217   : > { %p4271_p11 = pnand %p4270_p1, %p4703_p12  ;;  %p4277_p8 = scmp.lt.s32.totalorder %s4275_s11, %s4269_s2 }
 0x219   : > { %p4272_p5 = pneg %p4271_p11  ;;  %p4278_p2 = por %p4277_p8, %p4276_p0 }
 0x21b   : > { %p4279_p4 = pnand %p4278_p2, %p4272_p5 }
 0x21d   : > { %4282 = shalt.err (!%p4279_p4)
}
 0x21e   : > { %s5802_s9 = scalar_lea.sflag [#allocation27], %s4730_s19  ;;  %s946_s18 = scalar_lea.vmem [#allocation31], %s4733_s0 }
 0x21f   : > { %3594 = dma.hbm_to_vmem [thread:$0]  (%p4703_p12), %s5248_s21, 16, %s916_s23, %s5802_s9  }
 0x220   : > { %s953_s3 = sshll.u32 %s946_s18, 4  ;;  %s4283_s8 = scalar_lea.hbm %s5274_s4, 16  ;;  %s954_s3 = int_to_ptr.vmem [resolvable:$true] %s953_s3 }
 0x221   : > { %p4284_p3 = scmp.ne.s32.totalorder %s5274_s4, %s4283_s8  ;;  %s4287_s16 = scalar_lea.hbm %s5801_s26, 32 }
 0x222   : > { %p4288_p6 = scmp.lt.u32.totalorder %s5274_s4, %s5801_s26  ;;  %p4289_p9 = scmp.lt.u32.totalorder %s4287_s16, %s4283_s8 }
 0x223   : > { %p4285_p7 = pnand %p4284_p3, %p4703_p12  ;;  %p4291_p1 = scmp.lt.u32.totalorder %s4283_s8, %s5274_s4 }
 0x224   : > { %p4290_p10 = por %p4289_p9, %p4288_p6 }
 0x225   : > { %p4286_p13 = pneg %p4285_p7 }
 0x226   : > { %p4292_p11 = por %p4291_p1, %p4290_p10 }
 0x228   : > { %p4293_p5 = pnand %p4292_p11, %p4286_p13 }
 0x22a   : > { %4296 = shalt.err (!%p4293_p5)
}
 0x22b   : > { %s4297_s0 = scalar_lea.vmem %s954_s3, 16  ;;  %s4491_s21 = smov [#allocation31]  }
 0x22c   : > { %p4298_p0 = scmp.ne.s32.totalorder %s954_s3, %s4297_s0  ;;  %s4301_s23 = sshll.u32 %s4491_s21, 4  ;;  %s4302_s23 = int_to_ptr.vmem [resolvable:$false] %s4301_s23 }
 0x22d   : > { %s4303_s7 = scalar_lea.vmem %s4302_s23, 32  ;;  %p4304_p4 = scmp.lt.s32.totalorder %s954_s3, %s4302_s23 }
 0x22e   : > { %p4299_p8 = pnand %p4298_p0, %p4703_p12  ;;  %p4305_p3 = scmp.lt.s32.totalorder %s4303_s7, %s4297_s0 }
 0x230   : > { %p4300_p2 = pneg %p4299_p8  ;;  %p4306_p7 = por %p4305_p3, %p4304_p4 }
 0x232   : > { %p4307_p6 = pnand %p4306_p7, %p4300_p2 }
 0x234   : > { %4310 = shalt.err (!%p4307_p6)
}
 0x235   : > { %s5803_s2 = scalar_lea.sflag [#allocation30], %s4730_s19 }
 0x236   : > { %3596 = dma.hbm_to_vmem [thread:$0]  (%p4703_p12), %s5274_s4, 16, %s954_s3, %s5803_s2  }
 0x237 PF: > { %s5804_s1 = sld [smem:[#allocation50_spill]] }
 0x23d   : > { %p3343_p13 = scmp.ge.s32.totalorder %s5804_s1, 1  ;;  %p958_p9 = scmp.lt.s32.totalorder %s5804_s1, 5 }
 0x23f   : > { %p959_p10 = pnand %p3343_p13, %p958_p9 }
 0x240   : > { %s5805_s5 = sld [smem:[#allocation47_spill]] (!%p959_p10)  ;;  %s5806_s11 = sld [smem:[#allocation54_spill]] (!%p959_p10) }
 0x241   : > { %962 = sbr.rel (%p959_p10) target bundleno = 4317 (0x10dd), region = 96 }
 0x246   : > { %s5318_s9 = sand.u32 (!%p959_p10), 1, %s5805_s5   ;;  %p5807_p12 = scmp.ne.s32.totalorder (!%p959_p10), %s5806_s11, 0 }
 0x247   : > { %s3344_s18 = sshll.u32 (!%p959_p10), %s5318_s9, 3  ;;  %s965_s10 = scalar_lea.sflag (!%p959_p10), [#allocation3], %s5318_s9 }
 0x248   : > { %s5324_s19 = scalar_lea.vmem [#allocation2], %s3344_s18 }
 0x249   : > { %4384 = dma.done.wait (%p5807_p12), %s965_s10, 128  }
 0x24a   : > { %4386 = vsyncadd (%p5807_p12), %s965_s10, 4294967168  ;;  %s5808_s4 = sld [smem:[#allocation51_spill]]  ;;  %s5809_s3 = sld [smem:[#allocation44_spill]] }
 0x24b   : > { %s5810_s8 = sld [smem:[#allocation57_spill]] }
 0x250   : > { %s5331_s20 = sand.u32 1, %s5808_s4   ;;  %s5334_s30 = sand.u32 1, %s5809_s3  }
 0x251   : > { %s974_s16 = scalar_lea.sflag [#allocation6], %s5331_s20  ;;  %s976_s29 = scalar_lea.vmem [#allocation5], %s5334_s30 }
 0x252   : > { %p5811_p1 = scmp.ne.s32.totalorder %s5810_s8, 0 }
 0x254   : > { %4388 = dma.done.wait (%p5811_p1), %s974_s16, 32  }
 0x255   : > { %4390 = vsyncadd (%p5811_p1), %s974_s16, 4294967264  ;;  %s5343_s6 = sshll.u32 %s5334_s30, 4  ;;  %s984_s0 = scalar_lea.vmem [#allocation7], %s5334_s30 }
 0x256   : > { %s990_s21 = scalar_lea.sflag [#allocation9], %s5331_s20  ;;  %s993_s23 = scalar_lea.vmem [#allocation8], %s5343_s6 }
 0x257   : > { %4392 = dma.done.wait (%p5811_p1), %s990_s21, 272  }
 0x258   : > { %4394 = vsyncadd (%p5811_p1), %s990_s21, 4294967024  ;;  %s1001_s7 = scalar_lea.vmem [#allocation10], %s5334_s30  ;;  %s1007_s2 = scalar_lea.sflag [#allocation12], %s5331_s20 }
 0x259   : > { %4396 = dma.done.wait (%p5811_p1), %s1007_s2, 272  }
 0x25a   : > { %4398 = vsyncadd (%p5811_p1), %s1007_s2, 4294967024  ;;  %s1024_s11 = scalar_lea.sflag [#allocation15], %s5331_s20 }
 0x25b   : > { %4400 = dma.done.wait (%p5811_p1), %s1024_s11, 32  }
 0x25c   : > { %4402 = vsyncadd (%p5811_p1), %s1024_s11, 4294967264  ;;  %s1040_s3 = scalar_lea.sflag [#allocation18], %s5331_s20 }
 0x25d   : > { %4404 = dma.done.wait (%p5811_p1), %s1040_s3, 272  }
 0x25e   : > { %4406 = vsyncadd (%p5811_p1), %s1040_s3, 4294967024  ;;  %s3348_s21 = sshll.u32 %s5334_s30, 6  ;;  %s1057_s10 = scalar_lea.sflag [#allocation21], %s5331_s20 }
 0x25f   : > { %s5376_s11 = scalar_lea.vmem [#allocation20], %s3348_s21 }
 0x260   : > { %4408 = dma.done.wait (%p5811_p1), %s1057_s10, 1040  }
 0x261   : > { %4410 = vsyncadd (%p5811_p1), %s1057_s10, 4294966256  ;;  %s1074_s3 = scalar_lea.sflag [#allocation24], %s5331_s20 }
 0x262   : > { %4412 = dma.done.wait (%p5811_p1), %s1074_s3, 32  }
 0x263   : > { %4414 = vsyncadd (%p5811_p1), %s1074_s3, 4294967264  ;;  %s1090_s5 = scalar_lea.sflag [#allocation27], %s5331_s20 }
 0x264   : > { %4416 = dma.done.wait (%p5811_p1), %s1090_s5, 272  }
 0x265   : > { %4418 = vsyncadd (%p5811_p1), %s1090_s5, 4294967024  ;;  %s1101_s10 = scalar_lea.vmem [#allocation28], %s5334_s30  ;;  %s1107_s16 = scalar_lea.sflag [#allocation30], %s5331_s20 }
 0x266   : > { %s5398_s4 = scalar_lea.vmem [#allocation29], %s3348_s21 }
 0x267   : > { %4420 = dma.done.wait (%p5811_p1), %s1107_s16, 1040  }
 0x268   : > { %4422 = vsyncadd (%p5811_p1), %s1107_s16, 4294966256  ;;  %s1118_s3 = scalar_lea.vmem [#allocation31], %s5334_s30  ;;  %s5407_s2 = scalar_lea.vmem [#allocation32], %s3344_s18 }
 0x269   : > { %s5812_s1 = sld [smem:[#allocation48_spill]] }
 0x26f   : > { %p3352_p11 = scmp.ne.s32.totalorder %s5812_s1, 0 }
 0x270   : > { %v1256_v0 = vld [vmem:[%s5324_s19] sm:$0xff] (!%p3352_p11)  ;;  %vm1257_vm0 = vcmask (!%p3352_p11), 261120  }
 0x271   : > { %1255 = sbr.rel (%p3352_p11) target bundleno = 632 (0x278), region = 176  ;;  %1258 = vst.msk [vmem:[%s5407_s2] sm:$0xff] (!%p3352_p11), %vm1257_vm0, %v1256_v0 }
 0x278 PF: > { %v5413_v1 = vld [vmem:[%s5407_s2] sm:$0xff]  ;;  %vm1262_vm1 = vcmask 261120   ;;  %v3729_v8 = vld [vmem:[%s993_s23] sm:$0xff]   ;;  %v4492_v9 = vmov 0.0   ;;  %vm4493_vm2 = vmmov 0   ;;  %vm1786_vm3 = vcmask 64512  }
 0x279   : > { %v1263_v2 = vsel %vm1262_vm1, %v5413_v1, 0.0  ;;  %3458 = vmatprep.subr.bf16.mxu1 %v4492_v9  ;;  %3462 = vmatprep.mubr.msk.bf16.mxu1 %vm4493_vm2, %v4492_v9  ;;  %v3730_v10 = vld [vmem:[%s993_s23 + $0x8] sm:$0xff]   ;;  %vm2022_vm4 = vcmask 1043456   ;;  %s5813_s18 = scalar_lea.vmem [#allocation11], %s5343_s6  ;;  %s5815_s8 = scalar_lea.vmem [#allocation13], %s5334_s30 }
 0x27a   : > { %1264 = vadd.xlane.f32.xlu0 %v1263_v2  ;;  %3459 = vmatpush3.bf16.msra.mxu1 %v3729_v8  ;;  %v3353_v15 = vld [vmem:[%s976_s29] ss:$0 sm:$0xff]  ;;  %s5814_s19 = smov %s5813_s18  ;;  %s5816_s20 = scalar_lea.vmem [#allocation17], %s5343_s6 }
 0x27b   : > { %3472 = vmatprep.subr.bf16.mxu0 %v4492_v9  ;;  %3460 = vmatprep.subr.bf16.mxu1 %v4492_v9  ;;  %v3354_v17 = vld [vmem:[%s984_s0] ss:$0 sm:$0xff]  ;;  %s5817_s29 = smov %s5816_s20  ;;  %s5818_s0 = scalar_lea.vmem [#allocation14], %s5334_s30 }
 0x27c   : > { %3474 = vmatprep.mubr.msk.bf16.mxu0 %vm4493_vm2, %v4492_v9  ;;  %v3355_v21 = vld [vmem:[%s1001_s7] ss:$0 sm:$0xff]  ;;  %s5819_s23 = scalar_lea.vmem [#allocation16], %s5334_s30  ;;  %s5820_s7 = scalar_lea.vmem [#allocation19], %s5334_s30 }
 0x27d   : > { %s5821_s1 = scalar_lea.vmem [#allocation22], %s5334_s30  ;;  %s5822_s5 = scalar_lea.vmem [#allocation26], %s5343_s6 }
 0x27e   : > { %3461 = vmatpush3.bf16.msra.mxu1 %v3730_v10  ;;  %s5823_s16 = smov %s5822_s5  ;;  %s5824_s21 = scalar_lea.vmem [#allocation23], %s5334_s30 }
 0x27f   : > { %3466 = vmatprep.subr.bf16.mxu1 %v4492_v9  ;;  %s5826_s6 = sld [smem:[#allocation49_spill]] }
 0x307   : > { %v1265_v3 = vpop.xlane.xlu0 %1264 }
 0x308   : > { %v1267_v4 = vmul.f32 0.03125, %v1265_v3 }
 0x30a   : > { %v1268_v5 = vsub.f32 %v5413_v1, %v1267_v4 }
 0x30c   : > { %v1269_v6 = vmul.f32 %v1268_v5, %v1268_v5 }
 0x30e   : > { %v1270_v7 = vsel %vm1262_vm1, %v1269_v6, 0.0 }
 0x30f   : > { %1271 = vadd.xlane.f32.xlu0 %v1270_v7 }
 0x39c   : > { %v1272_v11 = vpop.xlane.xlu0 %1271 }
 0x39d   : > { %v1273_v12 = vmul.f32 0.03125, %v1272_v11 }
 0x39f   : > { %v1274_v13 = vadd.f32 1e-05, %v1273_v12 }
 0x3a1   : > { %3753 = vrsqrt.f32 %v1274_v13 }
 0x3ab   : > { %v3754_v14 = vpop.eup %3753 }
 0x3ac   : > { %v1276_v16 = vmul.f32 %v3754_v14, %v1268_v5 }
 0x3ae   : > { %v1283_v18 = vmul.f32 %v3353_v15, %v1276_v16 }
 0x3b0   : > { %v1290_v19 = vadd.f32 %v3354_v17, %v1283_v18 }
 0x3b2   : > { %v1295_v20 = vpack.c.bf16 %v1290_v19, %v1290_v19 }
 0x3b4   : > { %3463 = vmatmul.mubr.msk.bf16.vlgmr.msra.gmra.mrb[0].mxu1 %vm1262_vm1, %v1295_v20 }
 0x3b5   : > { %3468 = vmatprep.mubr.msk.bf16.mxu1 %vm4493_vm2, %v4492_v9 }
 0x487   : > { %v1352_v22 = vpop.f32.mrb[0].mxu1 }
 0x488   : > { %v3464_v23 = vpop.f32.mrb[1].mxu1  ;;  %v1353_v24 = vadd.f32 %v3355_v21, %v1352_v22 }
 0x489   : > { %v1355_v25 = vpop.f32.mrb[2].mxu1 }
 0x48a   : > { %1358 = vxpose.xlu1.b32.start.end [1/1] (short) (narrow) %v1353_v24, 96  ;;  %v3465_v26 = vpop.f32.mrb[3].mxu1 }
 0x50a   : > { %v1374_v27 = vpop.trf.xlu1 }
 0x50e   : > { %v1375_v28 = vpop.trf.xlu1 }
 0x512   : > { %v1376_v29 = vpop.trf.xlu1 }
 0x516   : > { %v1377_v30 = vpop.trf.xlu1 }
 0x51a   : > { %v1378_v31 = vpop.trf.xlu1 }
 0x51b   : > { %1522 = vxpose.xlu1.b32.start.end [1/1] (short) (narrow) %v1378_v31, 8 }
 0x51e   : > { %v1379_v32 = vpop.trf.xlu1 }
 0x51f   : > { %1554 = vxpose.xlu0.b32.start.end [1/1] (short) (narrow) %v1379_v32, 8 }
 0x522   : > { %v1380_v33 = vpop.trf.xlu1 }
 0x523   : > { %v3715_v34 = vpack.i.bf16 %v1380_v33, %v1374_v27 }
 0x525   : > { %3716 = vxpose.xlu1.b32.start.end [1/1] (short) (narrow) %v3715_v34, 8 }
 0x526   : > { %v1381_v35 = vpop.trf.xlu1 }
 0x527   : > { %v3722_v36 = vpack.i.bf16 %v1381_v35, %v1375_v28 }
 0x529   : > { %1454 = vxpose.xlu1.b32.start.end [1/1] (short) (narrow) %v1376_v29, 8  ;;  %3723 = vxpose.xlu0.b32.start.end [1/1] (short) (narrow) %v3722_v36, 8 }
 0x52a   : > { %v5440_v37 = vpop.trf.xlu1 }
 0x52d   : > { %1486 = vxpose.xlu0.b32.start.end [1/1] (short) (narrow) %v1377_v30, 8 }
 0x52e   : > { %v5442_v38 = vpop.trf.xlu1 }
 0x532   : > { %v5444_v39 = vpop.trf.xlu1 }
 0x536   : > { %v5446_v40 = vpop.trf.xlu1 }
 0x59b   : > { %v1538_v41 = vpop.trf.xlu1 }
 0x59c   : > { %v1650_v42 = vpack.c.bf16 %v1538_v41, %v1538_v41 }
 0x59e   : > { %v1791_v43 = vsel %vm1786_vm3, %v1650_v42, 0 }
 0x59f   : > { %v1570_v44 = vpop.trf.xlu0  ;;  %3467 = vmatpush3.bf16.xpose.msra.mxu1 %v1791_v43 }
 0x5a0   : > { %v1651_v45 = vpack.c.bf16 %v1570_v44, %v1570_v44  ;;  %3478 = vmatprep.subr.bf16.mxu1 %v4492_v9 }
 0x5a2   : > { %v1837_v46 = vsel %vm1786_vm3, %v1651_v45, 0 }
 0x5a3   : > { %3473 = vmatpush3.bf16.xpose.msra.mxu0 %v1837_v46 }
 0x5a4   : > { %3484 = vmatprep.subr.bf16.mxu0 %v4492_v9 }
 0x5a5   : > { %v3717_v47 = vpop.trf.xlu1 }
 0x5a6   : > { %v3721_v48 = vunpack.i.h.bf16 %v3717_v47  ;;  %v3718_v49 = vunpack.i.l.bf16 %v3717_v47 }
 0x5a8   : > { %v1518_v50 = vpack.c.bf16 %v3718_v49, %v3718_v49  ;;  %v1652_v51 = vpack.c.bf16 %v3721_v48, %v3721_v48 }
 0x5a9   : > { %v3724_v52 = vpop.trf.xlu0  ;;  %v1470_v58 = vpop.trf.xlu1 }
 0x5aa   : > { %v3728_v53 = vunpack.i.h.bf16 %v3724_v52  ;;  %v3725_v54 = vunpack.i.l.bf16 %v3724_v52  ;;  %3469 = vmatmul.mubr.msk.bf16.vlgmr.msra.gmra.mrb[4].mxu1 %vm1786_vm3, %v1518_v50  ;;  %v1883_v55 = vsel %vm1786_vm3, %v1652_v51, 0  ;;  %v1520_v60 = vpack.c.bf16 %v1470_v58, %v1470_v58 }
 0x5ab   : > { %3480 = vmatprep.mubr.msk.bf16.mxu1 %vm4493_vm2, %v4492_v9  ;;  %3479 = vmatpush3.bf16.xpose.msra.mxu1 %v1883_v55 }
 0x5ac   : > { %v1519_v56 = vpack.c.bf16 %v3725_v54, %v3725_v54  ;;  %v1653_v57 = vpack.c.bf16 %v3728_v53, %v3728_v53  ;;  %3490 = vmatprep.subr.bf16.mxu1 %v4492_v9 }
 0x5ad   : > { %v1502_v61 = vpop.trf.xlu0 }
 0x5ae   : > { %3475 = vmatmul.mubr.msk.bf16.vlgmr.msra.gmra.mrb[0].mxu0 %vm1786_vm3, %v1519_v56  ;;  %v1929_v59 = vsel %vm1786_vm3, %v1653_v57, 0  ;;  %v1521_v62 = vpack.c.bf16 %v1502_v61, %v1502_v61 }
 0x5af   : > { %3485 = vmatpush3.bf16.xpose.msra.mxu0 %v1929_v59  ;;  %3486 = vmatprep.mubr.msk.bf16.mxu0 %vm4493_vm2, %v4492_v9 }
 0x5b0   : > { %3496 = vmatprep.subr.bf16.mxu0 %v4492_v9 }
 0x5b2   : > { %3481 = vmatmul.mubr.msk.bf16.vlgmr.msra.gmra.mrb[8].mxu1 %vm1786_vm3, %v1520_v60 }
 0x5b3   : > { %3492 = vmatprep.mubr.msk.bf16.mxu1 %vm4493_vm2, %v4492_v9 }
 0x5b6   : > { %3487 = vmatmul.mubr.msk.bf16.vlgmr.msra.gmra.mrb[4].mxu0 %vm1786_vm3, %v1521_v62 }
 0x5b7   : > { %3498 = vmatprep.mubr.msk.bf16.mxu0 %vm4493_vm2, %v4492_v9 }
 0x67d   : > { %v1827_v63 = vpop.f32.mrb[4].mxu1 }
 0x67e   : > { %v1971_v0 = vsel %vm1786_vm3, %v1827_v63, -inf  ;;  %v3470_v2 = vpop.f32.mrb[5].mxu1 }
 0x67f   : > { %1972 = vmax.xlane.f32.xlu1 %v1971_v0  ;;  %v1830_v3 = vpop.f32.mrb[6].mxu1 }
 0x680   : > { %v3471_v4 = vpop.f32.mrb[7].mxu1 }
 0x681   : > { %v1873_v5 = vpop.f32.mrb[0].mxu0 }
 0x682   : > { %v3476_v6 = vpop.f32.mrb[1].mxu0  ;;  %v1974_v7 = vsel %vm1786_vm3, %v1873_v5, -inf }
 0x683   : > { %1975 = vmax.xlane.f32.xlu0 %v1974_v7  ;;  %v1876_v8 = vpop.f32.mrb[2].mxu0 }
 0x684   : > { %v3477_v10 = vpop.f32.mrb[3].mxu0 }
 0x685   : > { %v1919_v11 = vpop.f32.mrb[8].mxu1 }
 0x686   : > { %v1977_v12 = vsel %vm1786_vm3, %v1919_v11, -inf  ;;  %v3482_v13 = vpop.f32.mrb[9].mxu1 }
 0x687   : > { %1978 = vmax.xlane.f32.xlu1 %v1977_v12  ;;  %v1922_v14 = vpop.f32.mrb[10].mxu1 }
 0x688   : > { %v3483_v16 = vpop.f32.mrb[11].mxu1 }
 0x689   : > { %v1965_v15 = vpop.f32.mrb[4].mxu0 }
 0x68a   : > { %v1980_v17 = vsel %vm1786_vm3, %v1965_v15, -inf  ;;  %v3488_v18 = vpop.f32.mrb[5].mxu0 }
 0x68b   : > { %v1968_v19 = vpop.f32.mrb[6].mxu0  ;;  %1981 = vmax.xlane.f32.xlu1 %v1980_v17 }
 0x68c   : > { %v3489_v20 = vpop.f32.mrb[7].mxu0 }
 0x70c   : > { %v1973_v21 = vpop.xlane.xlu1 %1972 }
 0x70d   : > { %v1983_v22 = vsub.f32 %v1827_v63, %v1973_v21 }
 0x70f   : > { %v1987_v23 = vmul.f32 1.442695, %v1983_v22  ;;  %v3731_v22 = vld [vmem:[%s5813_s18] sm:$0xff]   ;;  %s5827_s18 = sld [smem:[#allocation58_spill]] }
 0x710   : > { %v1976_v24 = vpop.xlane.xlu0 %1975 }
 0x711   : > { %3755 = vpow2.f32 %v1987_v23  ;;  %v1984_v25 = vsub.f32 %v1873_v5, %v1976_v24  ;;  %v3732_v24 = vld [vmem:[%s5814_s19 + $0x8] sm:$0xff]   ;;  %s2875_s19 = sshll.u32 %s5407_s2, 4  ;;  %s5597_s19 = int_to_ptr.vmem [resolvable:$true] %s2875_s19 }
 0x713   : > { %v1989_v26 = vmul.f32 1.442695, %v1984_v25 }
 0x714   : > { %v1979_v27 = vpop.xlane.xlu1 %1978 }
 0x715   : > { %3757 = vpow2.f32 %v1989_v26  ;;  %v1985_v28 = vsub.f32 %v1919_v11, %v1979_v27  ;;  %p5830_p0 = scmp.ne.s32.totalorder %s5827_s18, 0 }
 0x717   : > { %v1991_v29 = vmul.f32 1.442695, %v1985_v28 }
 0x718   : > { %v1982_v36 = vpop.xlane.xlu1 %1981 }
 0x719   : > { %3759 = vpow2.f32 %v1991_v29  ;;  %v1986_v41 = vsub.f32 %v1965_v15, %v1982_v36 }
 0x71b   : > { %v3756_v30 = vpop.eup %3755  ;;  %v1993_v42 = vmul.f32 1.442695, %v1986_v41 }
 0x71c   : > { %v1995_v31 = vsel %vm1786_vm3, %v3756_v30, 0.0 }
 0x71d   : > { %1996 = vadd.xlane.f32.xlu1 %v1995_v31  ;;  %3761 = vpow2.f32 %v1993_v42  ;;  %v3367_v31 = vld [vmem:[%s5815_s8] ss:$0 sm:$0xff] }
 0x71f   : > { %v3758_v32 = vpop.eup %3757 }
 0x720   : > { %v1998_v33 = vsel %vm1786_vm3, %v3758_v32, 0.0 }
 0x721   : > { %1999 = vadd.xlane.f32.xlu0 %v1998_v33 }
 0x723   : > { %v3760_v34 = vpop.eup %3759 }
 0x724   : > { %v2001_v35 = vsel %vm1786_vm3, %v3760_v34, 0.0 }
 0x725   : > { %2002 = vadd.xlane.f32.xlu1 %v2001_v35 }
 0x727   : > { %v3762_v43 = vpop.eup %3761 }
 0x728   : > { %v2004_v44 = vsel %vm1786_vm3, %v3762_v43, 0.0 }
 0x74e   : > { %1686 = vxpose.xlu0.b32.start.end [1/1] (short) (narrow) %v5442_v38, 8 }
 0x758   : > { %1654 = vxpose.xlu1.b32.start.end [1/1] (short) (narrow) %v5440_v37, 8 }
 0x77b   : > { %2005 = vadd.xlane.f32.xlu0 %v2004_v44 }
 0x7a8   : > { %1718 = vxpose.xlu0.b32.start.end [1/1] (short) (narrow) %v5444_v39, 8 }
 0x7aa   : > { %v1997_v46 = vpop.xlane.xlu1 %1996 }
 0x7ac   : > { %1750 = vxpose.xlu0.b32.start.end [1/1] (short) (narrow) %v5446_v40, 8 }
 0x7ae   : > { %v2000_v45 = vpop.xlane.xlu0 %1999 }
 0x7af   : > { %3763 = vrcp.f32 %v2000_v45 }
 0x7b0   : > { %3765 = vrcp.f32 %v1997_v46 }
 0x7b2   : > { %v2003_v51 = vpop.xlane.xlu1 %2002 }
 0x7b3   : > { %3767 = vrcp.f32 %v2003_v51  ;;  %v3371_v51 = vld [vmem:[%s5818_s0] ss:$0 sm:$0xff] }
 0x7b9   : > { %v3764_v47 = vpop.eup %3763 }
 0x7ba   : > { %v2012_v37 = vmul.f32 %v3764_v47, %v3758_v32  ;;  %v3766_v39 = vpop.eup %3765 }
 0x7bb   : > { %v2011_v52 = vmul.f32 %v3766_v39, %v3756_v30 }
 0x7bc   : > { %v2016_v50 = vpack.c.bf16 %v2012_v37, %v2012_v37 }
 0x7bd   : > { %v2015_v55 = vpack.c.bf16 %v2011_v52, %v2011_v52  ;;  %v3768_v57 = vpop.eup %3767 }
 0x7be   : > { %v2013_v59 = vmul.f32 %v3768_v57, %v3760_v34  ;;  %v3737_v57 = vld [vmem:[%s5376_s11 + $0x10] sm:$0xff]  }
 0x7c0   : > { %v2017_v3 = vpack.c.bf16 %v2013_v59, %v2013_v59  ;;  %v3739_v59 = vld [vmem:[%s5376_s11 + $0x20] sm:$0xff]  }
 0x7ce   : > { %v1702_v38 = vpop.trf.xlu0 }
 0x7cf   : > { %v1783_v48 = vpack.c.bf16 %v1702_v38, %v1702_v38  ;;  %v3733_v38 = vld [vmem:[%s5816_s20] sm:$0xff]   ;;  %s5828_s20 = sld [smem:[#allocation76_spill]] }
 0x7d1   : > { %v2070_v49 = vsel %vm2022_vm4, %v1783_v48, 0 }
 0x7d2   : > { %3497 = vmatpush3.bf16.msra.mxu0 %v2070_v49 }
 0x7d3   : > { %3508 = vmatprep.subr.bf16.mxu0 %v4492_v9 }
 0x7d5   : > { %3499 = vmatmul.mubr.msk.bf16.vlgmr.msra.gmra.mrb[8].mxu0 %vm1786_vm3, %v2016_v50 }
 0x7d6   : > { %3510 = vmatprep.mubr.msk.bf16.mxu0 %vm4493_vm2, %v4492_v9 }
 0x7d8   : > { %v1670_v40 = vpop.trf.xlu1 }
 0x7d9   : > { %v1782_v53 = vpack.c.bf16 %v1670_v40, %v1670_v40  ;;  %v3372_v40 = vld [vmem:[%s5819_s23] ss:$0 sm:$0xff]  ;;  %s4494_s23 = smov [#allocation32]  }
 0x7db   : > { %v2024_v54 = vsel %vm2022_vm4, %v1782_v53, 0 }
 0x7dc   : > { %3491 = vmatpush3.bf16.msra.mxu1 %v2024_v54 }
 0x7dd   : > { %3502 = vmatprep.subr.bf16.mxu1 %v4492_v9 }
 0x7df   : > { %3493 = vmatmul.mubr.msk.bf16.vlgmr.msra.gmra.mrb[12].mxu1 %vm1786_vm3, %v2015_v55  ;;  %v3735_v55 = vld [vmem:[%s5376_s11] sm:$0xff]  }
 0x7e0   : > { %3504 = vmatprep.mubr.msk.bf16.mxu1 %vm4493_vm2, %v4492_v9 }
 0x808   : > { %v2006_v56 = vpop.xlane.xlu0 %2005 }
 0x809   : > { %3769 = vrcp.f32 %v2006_v56  ;;  %v3736_v56 = vld [vmem:[%s5376_s11 + $0x8] sm:$0xff]  }
 0x813   : > { %v3770_v61 = vpop.eup %3769 }
 0x814   : > { %v2014_v0 = vmul.f32 %v3770_v61, %v3762_v43  ;;  %v3741_v61 = vld [vmem:[%s5376_s11 + $0x30] sm:$0xff]  }
 0x816   : > { %v2018_v5 = vpack.c.bf16 %v2014_v0, %v2014_v0 }
 0x828   : > { %v1734_v58 = vpop.trf.xlu0 }
 0x829   : > { %v1784_v60 = vpack.c.bf16 %v1734_v58, %v1734_v58  ;;  %v3738_v58 = vld [vmem:[%s5376_s11 + $0x18] sm:$0xff]  }
 0x82b   : > { %v2116_v62 = vsel %vm2022_vm4, %v1784_v60, 0  ;;  %v3740_v60 = vld [vmem:[%s5376_s11 + $0x28] sm:$0xff]  }
 0x82c   : > { %v1766_v63 = vpop.trf.xlu0  ;;  %3503 = vmatpush3.bf16.msra.mxu1 %v2116_v62  ;;  %v3742_v62 = vld [vmem:[%s5376_s11 + $0x38] sm:$0xff]   ;;  %s5825_s11 = scalar_lea.vmem [#allocation25], %s5334_s30  ;;  %s2862_s30 = scalar_lea.sflag [#allocation4], %s5318_s9 }
 0x82d   : > { %v1785_v2 = vpack.c.bf16 %v1766_v63, %v1766_v63  ;;  %3514 = vmatprep.subr.bf16.mxu1 %v4492_v9  ;;  %v3373_v63 = vld [vmem:[%s5820_s7] ss:$0 sm:$0xff]  ;;  %s4315_s7 = sshll.u32 %s4494_s23, 4  ;;  %s4316_s7 = int_to_ptr.vmem [resolvable:$false] %s4315_s7 }
 0x82e   : > { %p4318_p4 = scmp.lt.s32.totalorder %s5597_s19, %s4316_s7 }
 0x82f   : > { %v2162_v4 = vsel %vm2022_vm4, %v1785_v2, 0  ;;  %3505 = vmatmul.mubr.msk.bf16.vlgmr.msra.gmra.mrb[16].mxu1 %vm1786_vm3, %v2017_v3 }
 0x830   : > { %3509 = vmatpush3.bf16.msra.mxu0 %v2162_v4  ;;  %3518 = vmatprep.mubr.msk.bf16.mxu1 %vm4493_vm2, %v4492_v9 }
 0x831   : > { %3522 = vmatprep.subr.bf16.mxu0 %v4492_v9  ;;  %3515 = vmatpush3.bf16.msra.mxu1 %v3731_v22 }
 0x832   : > { %3516 = vmatprep.subr.bf16.mxu1 %v4492_v9 }
 0x833   : > { %3511 = vmatmul.mubr.msk.bf16.vlgmr.msra.gmra.mrb[12].mxu0 %vm1786_vm3, %v2018_v5 }
 0x834   : > { %3526 = vmatprep.mubr.msk.bf16.mxu0 %vm4493_vm2, %v4492_v9  ;;  %3523 = vmatpush3.bf16.msra.mxu0 %v3733_v38  ;;  %v3749_v38 = vld [vmem:[%s5398_s4 + $0x20] sm:$0xff]  }
 0x835   : > { %3517 = vmatpush3.bf16.msra.mxu1 %v3732_v24  ;;  %3524 = vmatprep.subr.bf16.mxu0 %v4492_v9 }
 0x836   : > { %3530 = vmatprep.subr.bf16.mxu1 %v4492_v9 }
 0x8a8   : > { %v2106_v6 = vpop.f32.mrb[8].mxu0 }
 0x8a9   : > { %v3500_v7 = vpop.f32.mrb[9].mxu0  ;;  %2236 = vxpose.xlu0.b32.start.end [1/1] (short) (narrow) %v2106_v6, 8 }
 0x8aa   : > { %v2109_v8 = vpop.f32.mrb[10].mxu0 }
 0x8ab   : > { %v3501_v10 = vpop.f32.mrb[11].mxu0 }
 0x8b2   : > { %v2060_v11 = vpop.f32.mrb[12].mxu1 }
 0x8b3   : > { %2204 = vxpose.xlu1.b32.start.end [1/1] (short) (narrow) %v2060_v11, 8  ;;  %v3494_v12 = vpop.f32.mrb[13].mxu1 }
 0x8b4   : > { %v2063_v13 = vpop.f32.mrb[14].mxu1 }
 0x8b5   : > { %v3495_v14 = vpop.f32.mrb[15].mxu1 }
 0x8b6   : > { %v3378_v14 = vld [vmem:[%s5821_s1] ss:$0 sm:$0xff]  ;;  %s4317_s1 = scalar_lea.vmem %s4316_s7, 256 }
 0x902   : > { %v2152_v15 = vpop.f32.mrb[16].mxu1 }
 0x903   : > { %2268 = vxpose.xlu1.b32.start.end [1/1] (short) (narrow) %v2152_v15, 8  ;;  %v3506_v16 = vpop.f32.mrb[17].mxu1 }
 0x904   : > { %v2155_v17 = vpop.f32.mrb[18].mxu1 }
 0x905   : > { %v3507_v18 = vpop.f32.mrb[19].mxu1 }
 0x906   : > { %v2198_v19 = vpop.f32.mrb[12].mxu0 }
 0x907   : > { %2300 = vxpose.xlu0.b32.start.end [1/1] (short) (narrow) %v2198_v19, 8  ;;  %v3512_v20 = vpop.f32.mrb[13].mxu0 }
 0x908   : > { %v2201_v21 = vpop.f32.mrb[14].mxu0 }
 0x909   : > { %v3513_v23 = vpop.f32.mrb[15].mxu0 }
 0x929   : > { %v2252_v26 = vpop.trf.xlu0 }
 0x933   : > { %v2220_v25 = vpop.trf.xlu1 }
 0x934   : > { %2332 = vxpose.xlu1.b32.start [1/4] (short) (narrow) %v2220_v25, 8 }
 0x938   : > { %2333 = vxpose.xlu1.b32.cont [2/4] (short) (narrow) %v2252_v26, 8 }
 0x983   : > { %v2284_v27 = vpop.trf.xlu1 }
 0x984   : > { %2334 = vxpose.xlu1.b32.cont [3/4] (short) (narrow) %v2284_v27, 8  ;;  %v3743_v27 = vld [vmem:[%s5822_s5] sm:$0xff]  }
 0x987   : > { %v2316_v28 = vpop.trf.xlu0 }
 0x988   : > { %2335 = vxpose.xlu1.b32.end [4/4] (short) (narrow) %v2316_v28, 8  ;;  %v3744_v28 = vld [vmem:[%s5823_s16 + $0x8] sm:$0xff]  }
 0x9fc   : > { %v2348_v29 = vpop.trf.xlu1 }
 0x9fd   : > { %v2368_v30 = vpack.c.bf16 %v2348_v29, %v2348_v29 }
 0x9ff   : > { %3519 = vmatmul.mubr.msk.bf16.vlgmr.msra.gmra.mrb[20].mxu1 %vm1262_vm1, %v2368_v30 }
 0xa00   : > { %3546 = vmatprep.mubr.msk.bf16.mxu1 %vm4493_vm2, %v4492_v9  ;;  %3531 = vmatpush3.bf16.msra.mxu1 %v3735_v55  ;;  %v3393_v55 = vld [vmem:[%s1118_s3] ss:$0 sm:$0xff]  ;;  %s4311_s3 = scalar_lea.vmem %s5597_s19, 128 }
 0xa01   : > { %3532 = vmatprep.subr.bf16.mxu1 %v4492_v9  ;;  %p4312_p5 = scmp.ne.s32.totalorder %s5597_s19, %s4311_s3  ;;  %p4319_p3 = scmp.lt.s32.totalorder %s4317_s1, %s4311_s3 }
 0xa03   : > { %p4313_p8 = pnand %p4312_p5, %p5830_p0  ;;  %p4320_p7 = por %p4319_p3, %p4318_p4 }
 0xa04   : > { %3533 = vmatpush3.bf16.msra.mxu1 %v3736_v56 }
 0xa05   : > { %3534 = vmatprep.subr.bf16.mxu1 %v4492_v9  ;;  %p4314_p2 = pneg %p4313_p8 }
 0xa07   : > { %p4321_p6 = pnand %p4320_p7, %p4314_p2 }
 0xa08   : > { %3535 = vmatpush3.bf16.msra.mxu1 %v3737_v57 }
 0xa09   : > { %3536 = vmatprep.subr.bf16.mxu1 %v4492_v9 }
 0xa0c   : > { %3537 = vmatpush3.bf16.msra.mxu1 %v3738_v58 }
 0xa0d   : > { %3538 = vmatprep.subr.bf16.mxu1 %v4492_v9 }
 0xa10   : > { %3539 = vmatpush3.bf16.msra.mxu1 %v3739_v59 }
 0xa11   : > { %3540 = vmatprep.subr.bf16.mxu1 %v4492_v9 }
 0xa14   : > { %3541 = vmatpush3.bf16.msra.mxu1 %v3740_v60 }
 0xa15   : > { %3542 = vmatprep.subr.bf16.mxu1 %v4492_v9 }
 0xa18   : > { %3543 = vmatpush3.bf16.msra.mxu1 %v3741_v61 }
 0xa19   : > { %3544 = vmatprep.subr.bf16.mxu1 %v4492_v9 }
 0xa1c   : > { %3545 = vmatpush3.bf16.msra.mxu1 %v3742_v62 }
 0xad2   : > { %v2425_v32 = vpop.f32.mrb[20].mxu1 }
 0xad3   : > { %v2426_v33 = vadd.f32 %v3367_v31, %v2425_v32  ;;  %v3520_v34 = vpop.f32.mrb[21].mxu1 }
 0xad4   : > { %v2428_v35 = vpop.f32.mrb[22].mxu1 }
 0xad5   : > { %v5512_v36 = vadd.f32 %v2426_v33, %v5413_v1  ;;  %v3521_v41 = vpop.f32.mrb[23].mxu1  ;;  %v3734_v1 = vld [vmem:[%s5817_s29 + $0x8] sm:$0xff]   ;;  %v3387_v33 = vld [vmem:[%s5824_s21] ss:$0 sm:$0xff]  ;;  %s5829_s29 = smov %s5828_s20 }
 0xad6   : > { %3525 = vmatpush3.bf16.msra.mxu0 %v3734_v1  ;;  %v3388_v35 = vld [vmem:[%s5825_s11] ss:$0 sm:$0xff]  ;;  %v3750_v1 = vld [vmem:[%s5398_s4 + $0x28] sm:$0xff]  }
 0xad7   : > { %v2434_v42 = vsel %vm1262_vm1, %v5512_v36, 0.0  ;;  %3550 = vmatprep.subr.bf16.mxu0 %v4492_v9 }
 0xad8   : > { %2435 = vadd.xlane.f32.xlu0 %v2434_v42 }
 0xb65   : > { %v2436_v43 = vpop.xlane.xlu0 %2435 }
 0xb66   : > { %v2437_v44 = vmul.f32 0.03125, %v2436_v43  ;;  %v3745_v43 = vld [vmem:[%s5398_s4] sm:$0xff]  }
 0xb68   : > { %v2438_v45 = vsub.f32 %v5512_v36, %v2437_v44 }
 0xb6a   : > { %v2439_v46 = vmul.f32 %v2438_v45, %v2438_v45 }
 0xb6c   : > { %v2440_v47 = vsel %vm1262_vm1, %v2439_v46, 0.0  ;;  %v3747_v46 = vld [vmem:[%s5398_s4 + $0x10] sm:$0xff]  }
 0xb6d   : > { %2441 = vadd.xlane.f32.xlu1 %v2440_v47  ;;  %v3748_v47 = vld [vmem:[%s5398_s4 + $0x18] sm:$0xff]  }
 0xbfa   : > { %v2442_v37 = vpop.xlane.xlu1 %2441 }
 0xbfb   : > { %v2443_v48 = vmul.f32 0.03125, %v2442_v37  ;;  %v3751_v37 = vld [vmem:[%s5398_s4 + $0x30] sm:$0xff]  }
 0xbfd   : > { %v2444_v49 = vadd.f32 1e-05, %v2443_v48  ;;  %v3752_v48 = vld [vmem:[%s5398_s4 + $0x38] sm:$0xff]  }
 0xbff   : > { %3771 = vrsqrt.f32 %v2444_v49  ;;  %v3389_v49 = vld [vmem:[%s1101_s10] ss:$0 sm:$0xff] }
 0xc09   : > { %v3772_v50 = vpop.eup %3771 }
 0xc0a   : > { %v2446_v39 = vmul.f32 %v3772_v50, %v2438_v45  ;;  %v3746_v45 = vld [vmem:[%s5398_s4 + $0x8] sm:$0xff]   ;;  %s3403_s4 = sshll.u32 %s5826_s6, 7 }
 0xc0b   : > { %s5595_s0 = scalar_lea.hbm %s5828_s20, %s3403_s4 }
 0xc0c   : > { %v2453_v52 = vmul.f32 %v3371_v51, %v2446_v39 }
 0xc0e   : > { %v2460_v53 = vadd.f32 %v3372_v40, %v2453_v52 }
 0xc10   : > { %v2465_v54 = vpack.c.bf16 %v2460_v53, %v2460_v53 }
 0xc12   : > { %3527 = vmatmul.mubr.msk.bf16.vlgmr.msra.gmra.mrb[16].mxu0 %vm1262_vm1, %v2465_v54 }
 0xc13   : > { %3554 = vmatprep.mubr.msk.bf16.mxu0 %vm4493_vm2, %v4492_v9  ;;  %3551 = vmatpush3.bf16.msra.mxu0 %v3743_v27 }
 0xc14   : > { %3552 = vmatprep.subr.bf16.mxu0 %v4492_v9 }
 0xc17   : > { %3553 = vmatpush3.bf16.msra.mxu0 %v3744_v28 }
 0xc18   : > { %3558 = vmatprep.subr.bf16.mxu0 %v4492_v9 }
 0xce5   : > { %v2522_v0 = vpop.f32.mrb[16].mxu0 }
 0xce6   : > { %v2523_v2 = vadd.f32 %v3373_v63, %v2522_v0  ;;  %v3528_v3 = vpop.f32.mrb[17].mxu0 }
 0xce7   : > { %v2525_v4 = vpop.f32.mrb[18].mxu0 }
 0xce8   : > { %v3377_v5 = vmul.f32 -1.702, %v2523_v2  ;;  %v3529_v6 = vpop.f32.mrb[19].mxu0 }
 0xcea   : > { %v2530_v7 = vmul.f32 1.442695, %v3377_v5 }
 0xcec   : > { %3773 = vpow2.f32 %v2530_v7 }
 0xcf6   : > { %v3774_v8 = vpop.eup %3773 }
 0xcf7   : > { %v2532_v10 = vadd.f32 1.0, %v3774_v8 }
 0xcf9   : > { %3775 = vrcp.f32 %v2532_v10 }
 0xd03   : > { %v3776_v11 = vpop.eup %3775 }
 0xd04   : > { %v2535_v12 = vmul.f32 %v3776_v11, %v2523_v2 }
 0xd06   : > { %v2552_v13 = vpack.c.bf16 %v2535_v12, %v2535_v12 }
 0xd08   : > { %3547 = vmatmul.mubr.bf16.vlgmr.msra.gmra.mrb[24].mxu1 %v2552_v13 }
 0xddb   : > { %v2642_v15 = vpop.f32.mrb[24].mxu1 }
 0xddc   : > { %v5550_v16 = vadd.f32 %v3378_v14, %v2642_v15  ;;  %v3548_v17 = vpop.f32.mrb[25].mxu1 }
 0xddd   : > { %v2645_v18 = vpop.f32.mrb[26].mxu1 }
 0xdde   : > { %v3549_v19 = vpop.f32.mrb[27].mxu1  ;;  %v2648_v20 = vadd.f32 %v5550_v16, %v5512_v36 }
 0xde0   : > { %v2651_v21 = vsel %vm1262_vm1, %v2648_v20, 0.0 }
 0xde1   : > { %2652 = vadd.xlane.f32.xlu0 %v2651_v21 }
 0xe6e   : > { %v2653_v22 = vpop.xlane.xlu0 %2652 }
 0xe6f   : > { %v2654_v23 = vmul.f32 0.03125, %v2653_v22 }
 0xe71   : > { %v2655_v24 = vsub.f32 %v2648_v20, %v2654_v23 }
 0xe73   : > { %v2656_v25 = vmul.f32 %v2655_v24, %v2655_v24 }
 0xe75   : > { %v2657_v26 = vsel %vm1262_vm1, %v2656_v25, 0.0 }
 0xe76   : > { %2658 = vadd.xlane.f32.xlu0 %v2657_v26 }
 0xf03   : > { %v2659_v29 = vpop.xlane.xlu0 %2658 }
 0xf04   : > { %v2660_v30 = vmul.f32 0.03125, %v2659_v29 }
 0xf06   : > { %v2661_v31 = vadd.f32 1e-05, %v2660_v30 }
 0xf08   : > { %3777 = vrsqrt.f32 %v2661_v31 }
 0xf12   : > { %v3778_v32 = vpop.eup %3777 }
 0xf13   : > { %v2663_v34 = vmul.f32 %v3778_v32, %v2655_v24 }
 0xf15   : > { %v2670_v41 = vmul.f32 %v3387_v33, %v2663_v34 }
 0xf17   : > { %v2677_v42 = vadd.f32 %v3388_v35, %v2670_v41 }
 0xf19   : > { %v2682_v44 = vpack.c.bf16 %v2677_v42, %v2677_v42 }
 0xf1b   : > { %3555 = vmatmul.mubr.msk.bf16.vlgmr.msra.gmra.mrb[20].mxu0 %vm1262_vm1, %v2682_v44 }
 0xf1c   : > { %3559 = vmatpush3.bf16.msra.mxu0 %v3745_v43  ;;  %3574 = vmatprep.mubr.msk.bf16.mxu0 %vm4493_vm2, %v4492_v9 }
 0xf1d   : > { %3560 = vmatprep.subr.bf16.mxu0 %v4492_v9 }
 0xf20   : > { %3561 = vmatpush3.bf16.msra.mxu0 %v3746_v45 }
 0xf21   : > { %3562 = vmatprep.subr.bf16.mxu0 %v4492_v9 }
 0xf24   : > { %3563 = vmatpush3.bf16.msra.mxu0 %v3747_v46 }
 0xf25   : > { %3564 = vmatprep.subr.bf16.mxu0 %v4492_v9 }
 0xf28   : > { %3565 = vmatpush3.bf16.msra.mxu0 %v3748_v47 }
 0xf29   : > { %3566 = vmatprep.subr.bf16.mxu0 %v4492_v9 }
 0xf2c   : > { %3567 = vmatpush3.bf16.msra.mxu0 %v3749_v38 }
 0xf2d   : > { %3568 = vmatprep.subr.bf16.mxu0 %v4492_v9 }
 0xf30   : > { %3569 = vmatpush3.bf16.msra.mxu0 %v3750_v1 }
 0xf31   : > { %3570 = vmatprep.subr.bf16.mxu0 %v4492_v9 }
 0xf34   : > { %3571 = vmatpush3.bf16.msra.mxu0 %v3751_v37 }
 0xf35   : > { %3572 = vmatprep.subr.bf16.mxu0 %v4492_v9 }
 0xf38   : > { %3573 = vmatpush3.bf16.msra.mxu0 %v3752_v48 }
 0xfee   : > { %v2739_v50 = vpop.f32.mrb[20].mxu0 }
 0xfef   : > { %v2740_v51 = vadd.f32 %v3389_v49, %v2739_v50  ;;  %v3556_v39 = vpop.f32.mrb[21].mxu0 }
 0xff0   : > { %v2742_v40 = vpop.f32.mrb[22].mxu0 }
 0xff1   : > { %v2745_v52 = vmax.f32 %v2740_v51, 0.0  ;;  %v3557_v53 = vpop.f32.mrb[23].mxu0 }
 0xff3   : > { %v2762_v54 = vpack.c.bf16 %v2745_v52, %v2745_v52 }
 0xff5   : > { %3575 = vmatmul.mubr.bf16.vlgmr.msra.gmra.mrb[24].mxu0 %v2762_v54 }
0x10c8   : > { %v2852_v9 = vpop.f32.mrb[24].mxu0 }
0x10c9   : > { %v2853_v56 = vadd.f32 %v3393_v55, %v2852_v9  ;;  %v3576_v57 = vpop.f32.mrb[25].mxu0 }
0x10ca   : > { %v2855_v58 = vpop.f32.mrb[26].mxu0 }
0x10cb   : > { %v2858_v59 = vadd.f32 %v2853_v56, %v5512_v36  ;;  %v3577_v60 = vpop.f32.mrb[27].mxu0 }
0x10cd   : > { %v2859_v61 = vadd.f32 %v2858_v59, %v5550_v16 }
0x10cf   : > { %2860 = vst.msk [vmem:[%s5407_s2] sm:$0xff] %vm1262_vm1, %v2859_v61 }
0x10d0   : > { %4324 = shalt.err (!%p4321_p6)
}
0x10d1   : > { %s4325_s9 = scalar_lea.hbm %s5595_s0, 128  ;;  %s4329_s16 = scalar_lea.hbm %s5829_s29, 256 }
0x10d2   : > { %p4326_p13 = scmp.ne.s32.totalorder %s5595_s0, %s4325_s9  ;;  %p4330_p12 = scmp.lt.u32.totalorder %s5595_s0, %s5829_s29 }
0x10d3   : > { %p4331_p1 = scmp.lt.u32.totalorder %s4329_s16, %s4325_s9  ;;  %p4333_p5 = scmp.lt.u32.totalorder %s4325_s9, %s5595_s0 }
0x10d4   : > { %p4327_p9 = pnand %p4326_p13, %p5830_p0 }
0x10d5   : > { %p4332_p11 = por %p4331_p1, %p4330_p12 }
0x10d6   : > { %p4328_p10 = pneg %p4327_p9 }
0x10d7   : > { %p4334_p8 = por %p4333_p5, %p4332_p11 }
0x10d9   : > { %p4335_p2 = pnand %p4334_p8, %p4328_p10 }
0x10db   : > { %4338 = shalt.err (!%p4335_p2)
}
0x10dc   : > { %3616 = dma.vmem_to_hbm [thread:$0]  (%p5830_p0), %s5597_s19, 128, %s5595_s0, %s2862_s30  }
0x10dd PF: > { %s5831_s6 = sld [smem:[#allocation50_spill]]  ;;  %s5832_s4 = sld [smem:[#allocation46_spill]] }
0x10de   : > { %s5833_s10 = sld [smem:[#allocation59_spill]] }
0x10e3   : > { %p3622_p4 = scmp.ge.s32.totalorder %s5831_s6, 2  ;;  %s2887_s8 = sand.u32 1, %s5832_s4  }
0x10e4   : > { %p5834_p3 = scmp.ne.s32.totalorder %s5833_s10, 0  ;;  %s2888_s20 = scalar_lea.sflag [#allocation4], %s2887_s8 }
0x10e6   : > { %p3619_p7 = pnand %p3622_p4, %p5834_p3 }
0x10e8   : > { %4424 = dma.done.wait (!%p3619_p7), %s2888_s20, 128  }
0x10e9   : > { %4426 = vsyncadd (!%p3619_p7), %s2888_s20, 4294967168  ;;  %s62_s3 = sadd.s32 1, %s5831_s6   ;;  %s5835_s0 = sld [smem:[#allocation44_spill]] }
0x10ea   : > { %p59_p6 = scmp.ge.s32.totalorder %s62_s3, 6   ;;  %s5836_s30 = sld [smem:[#allocation45_spill]] }
0x10eb   : > { %s5837_s20 = sld [smem:[#allocation55_spill]]  ;;  %s5838_s21 = sld [smem:[#allocation47_spill]] }
0x10ec   : > { %s5839_s18 = sld [smem:[#allocation56_spill]]  ;;  %s5840_s19 = sld [smem:[#allocation52_spill]] }
0x10ed   : > { %s5841_s7 = sld [smem:[#allocation53_spill]]  ;;  %s5842_s1 = smov %s4449_s22 }
0x10ee   : > { %s5844_s2 = smov %s4461_s24  ;;  %s5845_s23 = smov %s4465_s25 }
0x10ef   :  { %61 = sbr.rel (!%p59_p6) target bundleno = 45 (0x2d), region = 361 }
0x10f2   : > { %s5843_s22 = smov %s5839_s18  ;;  %s5846_s24 = smov %s5840_s19 }
0x10f3   : > { %s5847_s25 = smov %s5841_s7 }
0x10f6   :  { %2893 = vsyncpa [#allocation3], 1 }
0x10f7   :  { %2895 = vsyncpa [#allocation3 + $0x1], 1 }
0x10f8   :  { %2896 = vsyncpa [#allocation6], 1 }
0x10f9   :  { %2898 = vsyncpa [#allocation6 + $0x1], 1 }
0x10fa   :  { %2899 = vsyncpa [#allocation9], 1 }
0x10fb   :  { %2901 = vsyncpa [#allocation9 + $0x1], 1 }
0x10fc   :  { %2902 = vsyncpa [#allocation12], 1 }
0x10fd   :  { %2904 = vsyncpa [#allocation12 + $0x1], 1 }
0x10fe   :  { %2905 = vsyncpa [#allocation15], 1 }
0x10ff   :  { %2907 = vsyncpa [#allocation15 + $0x1], 1 }
0x1100   :  { %2908 = vsyncpa [#allocation18], 1 }
0x1101   :  { %2910 = vsyncpa [#allocation18 + $0x1], 1 }
0x1102   :  { %2911 = vsyncpa [#allocation21], 1 }
0x1103   :  { %2913 = vsyncpa [#allocation21 + $0x1], 1 }
0x1104   :  { %2914 = vsyncpa [#allocation24], 1 }
0x1105   :  { %2916 = vsyncpa [#allocation24 + $0x1], 1 }
0x1106   :  { %2917 = vsyncpa [#allocation27], 1 }
0x1107   :  { %2919 = vsyncpa [#allocation27 + $0x1], 1 }
0x1108   :  { %2920 = vsyncpa [#allocation30], 1 }
0x1109   :  { %2922 = vsyncpa [#allocation30 + $0x1], 1 }
0x110a   :  { %2923 = vsyncpa [#allocation4], 1 }
0x110b   :  { %2925 = vsyncpa [#allocation4 + $0x1], 1 }

</bundles_post_ra>
